<compile_context>
chip_gen: v7x
topology: tpu7x:2x2x1
jax: 0.10.0
libtpu: 0.0.40
codegen_flags: <defaults>
</compile_context>

<pallas_src>
import functools
import math

import jax
import jax.numpy as jnp
from jax import lax
from jax.experimental import pallas as pl
from jax.experimental.pallas import tpu as pltpu


# ----------------------------------------------------------------------------
# Kernel
# ----------------------------------------------------------------------------
def _sth_kernel(
    t_ref,        # (1, H, W, BB)  VMEM  conv input (one batch block)
    h_ref,        # (1, BB, 5)     VMEM  "history" input (one batch block)
    cw_ref,       # (fs, ks)       SMEM  conv weight (scalars)
    cb_ref,       # (1, 1)         SMEM  conv bias (scalar)
    wih_ref,      # (1, 1, 4Hh)    VMEM  LSTM weight_ih (row)
    bg_ref,       # (1, 1, 4Hh)    VMEM  LSTM b_ih + b_hh (row)
    whh_ref,      # (Hh, 4Hh)      VMEM  LSTM weight_hh transposed
    w1a_ref,      # (Hh, 10)       VMEM  linearFC1[0] weight.T
    b1a_ref,      # (1, 10)
    w1b_ref,      # (10, 1)        VMEM  linearFC1[1] weight.T
    b1b_ref,      # (1, 1)
    wha_ref,      # (5, 10)        VMEM  historyFC[0] weight.T
    bha_ref,      # (1, 10)
    whb_ref,      # (10, 1)        VMEM  historyFC[1] weight.T
    bhb_ref,      # (1, 1)
    woa_ref,      # (2, 2)         VMEM  operateFC[0] weight.T
    boa_ref,      # (1, 2)
    wob_ref,      # (2, 1)         VMEM  operateFC[1] weight.T
    bob_ref,      # (1, 1)
    out_ref,      # (1, BB, 1)     VMEM  output block
    gx_ref,       # (L, BB, 4Hh)   VMEM  scratch: precomputed input-gate terms
    *, fs, ks, Hc, Wc, Hh,
):
    BB = out_ref.shape[1]
    L = Hc * Wc

    # ---- conv1Layer (Conv2d(1,1,(fs,ks)) + ReLU) fused with the LSTM
    # ---- input-gate precompute:
    # ----   gx[i*Wc+j, b, :] = relu(conv)[b, i, j] * w_ih + (b_ih + b_hh)
    w_row = wih_ref[...]                     # (1, 1, 4Hh)
    bg = bg_ref[...]                         # (1, 1, 4Hh)
    cb = cb_ref[0, 0]
    cw = [[cw_ref[kf, kw] for kw in range(ks)] for kf in range(fs)]

    for i in range(Hc):                      # per output row, ~15 live vregs
        acc = jnp.zeros((Wc, BB), jnp.float32)
        for kf in range(fs):
            for kw in range(ks):
                acc = acc + t_ref[0, i + kf, kw:kw + Wc, :] * cw[kf][kw]
        x_row = jnp.maximum(acc + cb, 0.0)                       # (Wc, BB)
        gx_ref[i * Wc:(i + 1) * Wc] = x_row[:, :, None] * w_row + bg

    # ---- LSTM (single layer, input_size=1, batch_first); gates [i|f|g|o] ----
    whh_t = whh_ref[...]                     # (Hh, 4Hh), constant RHS of every step

    U = 1                                    # manual unroll factor (divisor of L)
    for cand in (8, 6, 4, 3, 2):
        if L % cand == 0:
            U = cand
            break

    def lstm_block(blk, carry):
        h_st, c_st = carry
        base = blk * U
        for u in range(U):                   # manual unroll of U serial steps
            gates = (jnp.dot(h_st, whh_t, preferred_element_type=jnp.float32)
                     + gx_ref[base + u])                         # (BB, 4Hh)
            sig = jax.nn.sigmoid(gates)      # one EUP pass over the full vreg
            tnh = jnp.tanh(gates)            # one EUP pass over the full vreg
            i_g = sig[:, 0 * Hh:1 * Hh]
            f_g = sig[:, 1 * Hh:2 * Hh]
            g_g = tnh[:, 2 * Hh:3 * Hh]
            o_g = sig[:, 3 * Hh:4 * Hh]
            c_st = f_g * c_st + i_g * g_g
            h_st = o_g * jnp.tanh(c_st)      # (BB, Hh)
        return h_st, c_st

    h0 = jnp.zeros((BB, Hh), jnp.float32)
    c0 = jnp.zeros((BB, Hh), jnp.float32)
    h_st, c_st = lax.fori_loop(0, L // U, lstm_block, (h0, c0))

    # ---- linearFC1: Hh -> 10 -> 1 -------------------------------------------
    fc = jnp.dot(h_st, w1a_ref[...], preferred_element_type=jnp.float32) + b1a_ref[...]
    fc = jnp.dot(fc, w1b_ref[...], preferred_element_type=jnp.float32) + b1b_ref[...]   # (BB,1)

    # ---- historyFC: 5 -> 10 -> 1 --------------------------------------------
    his = jnp.dot(h_ref[0], wha_ref[...], preferred_element_type=jnp.float32) + bha_ref[...]
    his = jnp.dot(his, whb_ref[...], preferred_element_type=jnp.float32) + bhb_ref[...]  # (BB,1)

    # ---- cat + operateFC: 2 -> 2 -> 1 ---------------------------------------
    # cat([fc, his], dim=1) @ Woa.T == fc * Woa.T[0,:] + his * Woa.T[1,:]
    woa_t = woa_ref[...]                                         # (2, 2) == Woa.T
    op = fc * woa_t[0:1, :] + his * woa_t[1:2, :] + boa_ref[...]          # (BB, 2)
    out = jnp.dot(op, wob_ref[...], preferred_element_type=jnp.float32) + bob_ref[...]
    out_ref[0] = out                                             # (BB, 1)


# ----------------------------------------------------------------------------
# Wrapper
# ----------------------------------------------------------------------------
def sth_forward(t_nchw, h, p, *, neigh_size, filter_size, hidden_size,
                batch_block=8):
    B, C, H, W = t_nchw.shape
    assert C == 1
    fs, ks = filter_size, neigh_size
    Hc, Wc = H - fs + 1, W - ks + 1
    L = Hc * Wc
    Hh = hidden_size
    f32 = jnp.float32

    BB = batch_block if (batch_block > 0 and B % batch_block == 0) else B
    nb = B // BB

    # Layout plumbing only (no compute): (B,1,H,W) -> (nb,H,W,BB); batch-first h.
    t_k = jnp.transpose(t_nchw[:, 0].astype(f32), (1, 2, 0))     # (H, W, B)
    t_k = t_k.reshape(H, W, nb, BB).transpose(2, 0, 1, 3)        # (nb, H, W, BB)
    h_k = h.astype(f32).reshape(nb, BB, 5)

    row = lambda v, n: jnp.asarray(v, f32).reshape(1, n)
    conv_w = jnp.asarray(p["conv_w"], f32).reshape(fs, ks)
    conv_b = jnp.asarray(p["conv_b"], f32).reshape(1, 1)
    wih_row = jnp.asarray(p["w_ih"], f32).reshape(1, 1, 4 * Hh)
    bg_row = (jnp.asarray(p["b_ih"], f32)
              + jnp.asarray(p["b_hh"], f32)).reshape(1, 1, 4 * Hh)
    whh_t = jnp.asarray(p["w_hh"], f32).T                        # (Hh, 4Hh)

    args = (
        t_k, h_k, conv_w, conv_b,
        wih_row, bg_row, whh_t,
        jnp.asarray(p["w1a"], f32).T, row(p["b1a"], 10),
        jnp.asarray(p["w1b"], f32).T, row(p["b1b"], 1),
        jnp.asarray(p["wha"], f32).T, row(p["bha"], 10),
        jnp.asarray(p["whb"], f32).T, row(p["bhb"], 1),
        jnp.asarray(p["woa"], f32).T, row(p["boa"], 2),
        jnp.asarray(p["wob"], f32).T, row(p["bob"], 1),
    )

    kern = functools.partial(_sth_kernel, fs=fs, ks=ks, Hc=Hc, Wc=Wc, Hh=Hh)
    vmem = pl.BlockSpec(memory_space=pltpu.MemorySpace.VMEM)
    smem = pl.BlockSpec(memory_space=pltpu.MemorySpace.SMEM)
    in_specs = [
        pl.BlockSpec((1, H, W, BB), lambda g: (g, 0, 0, 0)),     # conv input block
        pl.BlockSpec((1, BB, 5), lambda g: (g, 0, 0)),           # history block
        smem, smem,                                              # conv scalars
    ] + [vmem] * 15                                              # weights (whole)
    out_spec = pl.BlockSpec((1, BB, 1), lambda g: (g, 0, 0))

    # Advisory cost estimate; bytes_accessed counts HBM traffic only.
    flops = (2 * L * B * 4 * Hh * Hh          # recurrent matmul
             + 10 * L * B * Hh                # gate elementwise
             + 2 * L * B * 4 * Hh             # gx precompute
             + 2 * fs * ks * L * B            # conv
             + 2 * B * (Hh * 10 + 10 + 5 * 10 + 10 + 4 + 2))
    transcendentals = L * B * 9 * Hh          # sigmoid + tanh (4Hh) + tanh (Hh)
    hbm_bytes = (sum(int(a.size) for a in args) + B) * 4
    ce = pl.CostEstimate(flops=int(flops), transcendentals=int(transcendentals),
                         bytes_accessed=int(hbm_bytes))

    out = pl.pallas_call(
        kern,
        out_shape=jax.ShapeDtypeStruct((nb, BB, 1), f32),
        grid=(nb,),
        in_specs=in_specs,
        out_specs=out_spec,
        scratch_shapes=[pltpu.VMEM((L, BB, 4 * Hh), f32)],
        compiler_params=pltpu.CompilerParams(
            dimension_semantics=("parallel",)),
        cost_estimate=ce,
    )(*args)
    return out.reshape(B, 1)


# ----------------------------------------------------------------------------
# Deterministic parameter init (PyTorch-natural (out, in) weight layouts)
# ----------------------------------------------------------------------------
def init_params(key, neigh_size, filter_size, hidden_size):
    Hh = hidden_size
    keys = jax.random.split(key, 18)

    def u(k, shape, fan_in):
        bound = 1.0 / math.sqrt(fan_in)
        return jax.random.uniform(k, shape, jnp.float32, -bound, bound)

    return dict(
        conv_w=u(keys[0], (filter_size, neigh_size), filter_size * neigh_size),
        conv_b=u(keys[1], (), filter_size * neigh_size),
        w_ih=u(keys[2], (4 * Hh, 1), Hh),
        w_hh=u(keys[3], (4 * Hh, Hh), Hh),
        b_ih=u(keys[4], (4 * Hh,), Hh),
        b_hh=u(keys[5], (4 * Hh,), Hh),
        w1a=u(keys[6], (10, Hh), Hh), b1a=u(keys[7], (10,), Hh),
        w1b=u(keys[8], (1, 10), 10), b1b=u(keys[9], (1,), 10),
        wha=u(keys[10], (10, 5), 5), bha=u(keys[11], (10,), 5),
        whb=u(keys[12], (1, 10), 10), bhb=u(keys[13], (1,), 10),
        woa=u(keys[14], (2, 2), 2), boa=u(keys[15], (2,), 2),
        wob=u(keys[16], (1, 2), 2), bob=u(keys[17], (1,), 2),
    )


# ----------------------------------------------------------------------------
# Pure-JAX reference (mirrors the PyTorch forward) for correctness checking
# ----------------------------------------------------------------------------
def reference_forward(t_nchw, h, p, *, neigh_size, filter_size, hidden_size):
    B, _, H, W = t_nchw.shape
    fs, ksz, Hh = filter_size, neigh_size, hidden_size
    Hc, Wc = H - fs + 1, W - ksz + 1
    x = t_nchw[:, 0].astype(jnp.float32)
    conv = jnp.zeros((B, Hc, Wc), jnp.float32)
    for kf in range(fs):
        for kw in range(ksz):
            conv = conv + x[:, kf:kf + Hc, kw:kw + Wc] * p["conv_w"][kf, kw]
    conv = jnp.maximum(conv + p["conv_b"], 0.0)
    seq = conv.reshape(B, Hc * Wc, 1)

    def step(carry, x_t):
        h_st, c_st = carry
        gates = x_t @ p["w_ih"].T + h_st @ p["w_hh"].T + p["b_ih"] + p["b_hh"]
        i = jax.nn.sigmoid(gates[:, 0:Hh]); f = jax.nn.sigmoid(gates[:, Hh:2 * Hh])
        g = jnp.tanh(gates[:, 2 * Hh:3 * Hh]); o = jax.nn.sigmoid(gates[:, 3 * Hh:4 * Hh])
        c_new = f * c_st + i * g
        h_new = o * jnp.tanh(c_new)
        return (h_new, c_new), None

    init = (jnp.zeros((B, Hh), jnp.float32), jnp.zeros((B, Hh), jnp.float32))
    (hT, _), _ = lax.scan(step, init, jnp.swapaxes(seq, 0, 1))
    t1 = hT @ p["w1a"].T + p["b1a"]
    t1 = t1 @ p["w1b"].T + p["b1b"]
    his = h.astype(jnp.float32) @ p["wha"].T + p["bha"]
    his = his @ p["whb"].T + p["bhb"]
    cat = jnp.concatenate([t1, his], axis=1)
    op = cat @ p["woa"].T + p["boa"]
    return op @ p["wob"].T + p["bob"]


# ----------------------------------------------------------------------------
if __name__ == "__main__":
    # Larger (but still small) batch per the perf review: amortizes the 48
    # serial LSTM steps and exercises the batch grid (2 blocks of 8).
    B, H, W = 16, 8, 8
    neigh_size, filter_size = 3, 1
    rnn_param = {"input_size": 1, "hidden_size": 32, "num_layers": 1}

    kt, kh = jax.random.split(jax.random.PRNGKey(0))
    t = jax.random.normal(kt, (B, 1, H, W), jnp.float32)
    h = jax.random.normal(kh, (B, 5), jnp.float32)
    params = init_params(jax.random.PRNGKey(42), neigh_size, filter_size,
                         rnn_param["hidden_size"])

    out = sth_forward(t, h, params, neigh_size=neigh_size,
                      filter_size=filter_size,
                      hidden_size=rnn_param["hidden_size"])
    out = jax.block_until_ready(out)
    assert out.shape == (B, 1)

    ref = reference_forward(t, h, params, neigh_size=neigh_size,
                            filter_size=filter_size,
                            hidden_size=rnn_param["hidden_size"])
    err = float(jnp.max(jnp.abs(out - ref)))
    if err > 1e-3:
        raise AssertionError(f"kernel mismatch vs reference: max abs err = {err}")
    print("KERNEL_OK")
</pallas_src>

<mosaic_0001>
module attributes {stable_mosaic.version = 11 : i64} {
  func.func @_sth_kernel(%arg0: i32, %arg1: memref<1x8x8x8xf32, #tpu.memory_space<vmem>>, %arg2: memref<1x8x5xf32, #tpu.memory_space<vmem>>, %arg3: memref<1x3xf32, #tpu.memory_space<smem>>, %arg4: memref<1x1xf32, #tpu.memory_space<smem>>, %arg5: memref<1x1x128xf32, #tpu.memory_space<vmem>>, %arg6: memref<1x1x128xf32, #tpu.memory_space<vmem>>, %arg7: memref<32x128xf32, #tpu.memory_space<vmem>>, %arg8: memref<32x10xf32, #tpu.memory_space<vmem>>, %arg9: memref<1x10xf32, #tpu.memory_space<vmem>>, %arg10: memref<10x1xf32, #tpu.memory_space<vmem>>, %arg11: memref<1x1xf32, #tpu.memory_space<vmem>>, %arg12: memref<5x10xf32, #tpu.memory_space<vmem>>, %arg13: memref<1x10xf32, #tpu.memory_space<vmem>>, %arg14: memref<10x1xf32, #tpu.memory_space<vmem>>, %arg15: memref<1x1xf32, #tpu.memory_space<vmem>>, %arg16: memref<2x2xf32, #tpu.memory_space<vmem>>, %arg17: memref<1x2xf32, #tpu.memory_space<vmem>>, %arg18: memref<2x1xf32, #tpu.memory_space<vmem>>, %arg19: memref<1x1xf32, #tpu.memory_space<vmem>>, %arg20: memref<1x8x1xf32, #tpu.memory_space<vmem>>, %arg21: memref<48x8x128xf32, #tpu.memory_space<vmem>>) attributes {dimension_semantics = [#tpu.dimension_semantics<parallel>], iteration_bounds = array<i64: 2>, scalar_prefetch = 0 : i64, scratch_operands = 1 : i64, tpu.core_type = #tpu.core_type<tc>, window_params = [{transform_indices = @transform_0, window_bounds = array<i64: 1, 8, 8, 8>}, {transform_indices = @transform_1, window_bounds = array<i64: 1, 8, 5>}, {transform_indices = @transform_2, window_bounds = array<i64: 1, 3>}, {transform_indices = @transform_3, window_bounds = array<i64: 1, 1>}, {pipeline_mode = #tpu.pipeline_mode<synchronous>, transform_indices = @transform_4, window_bounds = array<i64: 1, 1, 128>}, {pipeline_mode = #tpu.pipeline_mode<synchronous>, transform_indices = @transform_5, window_bounds = array<i64: 1, 1, 128>}, {pipeline_mode = #tpu.pipeline_mode<synchronous>, transform_indices = @transform_6, window_bounds = array<i64: 32, 128>}, {pipeline_mode = #tpu.pipeline_mode<synchronous>, transform_indices = @transform_7, window_bounds = array<i64: 32, 10>}, {pipeline_mode = #tpu.pipeline_mode<synchronous>, transform_indices = @transform_8, window_bounds = array<i64: 1, 10>}, {pipeline_mode = #tpu.pipeline_mode<synchronous>, transform_indices = @transform_9, window_bounds = array<i64: 10, 1>}, {pipeline_mode = #tpu.pipeline_mode<synchronous>, transform_indices = @transform_10, window_bounds = array<i64: 1, 1>}, {pipeline_mode = #tpu.pipeline_mode<synchronous>, transform_indices = @transform_11, window_bounds = array<i64: 5, 10>}, {pipeline_mode = #tpu.pipeline_mode<synchronous>, transform_indices = @transform_12, window_bounds = array<i64: 1, 10>}, {pipeline_mode = #tpu.pipeline_mode<synchronous>, transform_indices = @transform_13, window_bounds = array<i64: 10, 1>}, {pipeline_mode = #tpu.pipeline_mode<synchronous>, transform_indices = @transform_14, window_bounds = array<i64: 1, 1>}, {pipeline_mode = #tpu.pipeline_mode<synchronous>, transform_indices = @transform_15, window_bounds = array<i64: 2, 2>}, {pipeline_mode = #tpu.pipeline_mode<synchronous>, transform_indices = @transform_16, window_bounds = array<i64: 1, 2>}, {pipeline_mode = #tpu.pipeline_mode<synchronous>, transform_indices = @transform_17, window_bounds = array<i64: 2, 1>}, {pipeline_mode = #tpu.pipeline_mode<synchronous>, transform_indices = @transform_18, window_bounds = array<i64: 1, 1>}, {transform_indices = @transform_19, window_bounds = array<i64: 1, 8, 1>}]} {
    %c0 = arith.constant 0 : index
    %c0_0 = arith.constant 0 : index
    %c0_1 = arith.constant 0 : index
    %0 = vector.load %arg5[%c0, %c0_0, %c0_1] : memref<1x1x128xf32, #tpu.memory_space<vmem>>, vector<1x1x128xf32>
    %c0_2 = arith.constant 0 : index
    %c0_3 = arith.constant 0 : index
    %c0_4 = arith.constant 0 : index
    %1 = vector.load %arg6[%c0_2, %c0_3, %c0_4] : memref<1x1x128xf32, #tpu.memory_space<vmem>>, vector<1x1x128xf32>
    %c0_5 = arith.constant 0 : index
    %c0_6 = arith.constant 0 : index
    %2 = memref.load %arg4[%c0_5, %c0_6] : memref<1x1xf32, #tpu.memory_space<smem>>
    %c0_7 = arith.constant 0 : index
    %c0_8 = arith.constant 0 : index
    %3 = memref.load %arg3[%c0_7, %c0_8] : memref<1x3xf32, #tpu.memory_space<smem>>
    %c0_9 = arith.constant 0 : index
    %c1 = arith.constant 1 : index
    %4 = memref.load %arg3[%c0_9, %c1] : memref<1x3xf32, #tpu.memory_space<smem>>
    %c0_10 = arith.constant 0 : index
    %c2 = arith.constant 2 : index
    %5 = memref.load %arg3[%c0_10, %c2] : memref<1x3xf32, #tpu.memory_space<smem>>
    %cst = arith.constant 0.000000e+00 : f32
    %6 = vector.broadcast %cst : f32 to vector<6x8xf32>
    %c0_11 = arith.constant 0 : index
    %c0_12 = arith.constant 0 : index
    %c0_13 = arith.constant 0 : index
    %c0_14 = arith.constant 0 : index
    %7 = vector.load %arg1[%c0_11, %c0_12, %c0_13, %c0_14] : memref<1x8x8x8xf32, #tpu.memory_space<vmem>>, vector<1x1x6x8xf32>
    %8 = vector.shape_cast %7 : vector<1x1x6x8xf32> to vector<6x8xf32>
    %9 = vector.broadcast %3 : f32 to vector<6x8xf32>
    %10 = arith.mulf %8, %9 : vector<6x8xf32>
    %11 = arith.addf %6, %10 : vector<6x8xf32>
    %c0_15 = arith.constant 0 : index
    %c0_16 = arith.constant 0 : index
    %c1_17 = arith.constant 1 : index
    %c0_18 = arith.constant 0 : index
    %12 = vector.load %arg1[%c0_15, %c0_16, %c1_17, %c0_18] : memref<1x8x8x8xf32, #tpu.memory_space<vmem>>, vector<1x1x6x8xf32>
    %13 = vector.shape_cast %12 : vector<1x1x6x8xf32> to vector<6x8xf32>
    %14 = vector.broadcast %4 : f32 to vector<6x8xf32>
    %15 = arith.mulf %13, %14 : vector<6x8xf32>
    %16 = arith.addf %11, %15 : vector<6x8xf32>
    %c0_19 = arith.constant 0 : index
    %c0_20 = arith.constant 0 : index
    %c2_21 = arith.constant 2 : index
    %c0_22 = arith.constant 0 : index
    %17 = vector.load %arg1[%c0_19, %c0_20, %c2_21, %c0_22] : memref<1x8x8x8xf32, #tpu.memory_space<vmem>>, vector<1x1x6x8xf32>
    %18 = vector.shape_cast %17 : vector<1x1x6x8xf32> to vector<6x8xf32>
    %19 = vector.broadcast %5 : f32 to vector<6x8xf32>
    %20 = arith.mulf %18, %19 : vector<6x8xf32>
    %21 = arith.addf %16, %20 : vector<6x8xf32>
    %22 = vector.broadcast %2 : f32 to vector<6x8xf32>
    %23 = arith.addf %21, %22 : vector<6x8xf32>
    %cst_23 = arith.constant 0.000000e+00 : f32
    %24 = vector.broadcast %cst_23 : f32 to vector<6x8xf32>
    %25 = arith.maximumf %23, %24 : vector<6x8xf32>
    %26 = vector.shape_cast %25 : vector<6x8xf32> to vector<6x8x1xf32>
    %27 = vector.broadcast %26 : vector<6x8x1xf32> to vector<6x8x128xf32>
    %28 = vector.broadcast %0 : vector<1x1x128xf32> to vector<6x8x128xf32>
    %29 = arith.mulf %27, %28 : vector<6x8x128xf32>
    %30 = vector.broadcast %1 : vector<1x1x128xf32> to vector<6x8x128xf32>
    %31 = arith.addf %29, %30 : vector<6x8x128xf32>
    %c0_24 = arith.constant 0 : index
    %c0_25 = arith.constant 0 : index
    %c0_26 = arith.constant 0 : index
    %32 = vector.load %arg21[%c0_24, %c0_25, %c0_26] : memref<48x8x128xf32, #tpu.memory_space<vmem>>, vector<6x8x128xf32>
    tpu.vector_store %arg21[%c0_24, %c0_25, %c0_26], %31 {strides = array<i32>} : memref<48x8x128xf32, #tpu.memory_space<vmem>>, vector<6x8x128xf32>,
    %cst_27 = arith.constant 0.000000e+00 : f32
    %33 = vector.broadcast %cst_27 : f32 to vector<6x8xf32>
    %c0_28 = arith.constant 0 : index
    %c1_29 = arith.constant 1 : index
    %c0_30 = arith.constant 0 : index
    %c0_31 = arith.constant 0 : index
    %34 = vector.load %arg1[%c0_28, %c1_29, %c0_30, %c0_31] : memref<1x8x8x8xf32, #tpu.memory_space<vmem>>, vector<1x1x6x8xf32>
    %35 = vector.shape_cast %34 : vector<1x1x6x8xf32> to vector<6x8xf32>
    %36 = vector.broadcast %3 : f32 to vector<6x8xf32>
    %37 = arith.mulf %35, %36 : vector<6x8xf32>
    %38 = arith.addf %33, %37 : vector<6x8xf32>
    %c0_32 = arith.constant 0 : index
    %c1_33 = arith.constant 1 : index
    %c1_34 = arith.constant 1 : index
    %c0_35 = arith.constant 0 : index
    %39 = vector.load %arg1[%c0_32, %c1_33, %c1_34, %c0_35] : memref<1x8x8x8xf32, #tpu.memory_space<vmem>>, vector<1x1x6x8xf32>
    %40 = vector.shape_cast %39 : vector<1x1x6x8xf32> to vector<6x8xf32>
    %41 = vector.broadcast %4 : f32 to vector<6x8xf32>
    %42 = arith.mulf %40, %41 : vector<6x8xf32>
    %43 = arith.addf %38, %42 : vector<6x8xf32>
    %c0_36 = arith.constant 0 : index
    %c1_37 = arith.constant 1 : index
    %c2_38 = arith.constant 2 : index
    %c0_39 = arith.constant 0 : index
    %44 = vector.load %arg1[%c0_36, %c1_37, %c2_38, %c0_39] : memref<1x8x8x8xf32, #tpu.memory_space<vmem>>, vector<1x1x6x8xf32>
    %45 = vector.shape_cast %44 : vector<1x1x6x8xf32> to vector<6x8xf32>
    %46 = vector.broadcast %5 : f32 to vector<6x8xf32>
    %47 = arith.mulf %45, %46 : vector<6x8xf32>
    %48 = arith.addf %43, %47 : vector<6x8xf32>
    %49 = vector.broadcast %2 : f32 to vector<6x8xf32>
    %50 = arith.addf %48, %49 : vector<6x8xf32>
    %cst_40 = arith.constant 0.000000e+00 : f32
    %51 = vector.broadcast %cst_40 : f32 to vector<6x8xf32>
    %52 = arith.maximumf %50, %51 : vector<6x8xf32>
    %53 = vector.shape_cast %52 : vector<6x8xf32> to vector<6x8x1xf32>
    %54 = vector.broadcast %53 : vector<6x8x1xf32> to vector<6x8x128xf32>
    %55 = vector.broadcast %0 : vector<1x1x128xf32> to vector<6x8x128xf32>
    %56 = arith.mulf %54, %55 : vector<6x8x128xf32>
    %57 = vector.broadcast %1 : vector<1x1x128xf32> to vector<6x8x128xf32>
    %58 = arith.addf %56, %57 : vector<6x8x128xf32>
    %c6 = arith.constant 6 : index
    %c0_41 = arith.constant 0 : index
    %c0_42 = arith.constant 0 : index
    %59 = vector.load %arg21[%c6, %c0_41, %c0_42] : memref<48x8x128xf32, #tpu.memory_space<vmem>>, vector<6x8x128xf32>
    tpu.vector_store %arg21[%c6, %c0_41, %c0_42], %58 {strides = array<i32>} : memref<48x8x128xf32, #tpu.memory_space<vmem>>, vector<6x8x128xf32>,
    %cst_43 = arith.constant 0.000000e+00 : f32
    %60 = vector.broadcast %cst_43 : f32 to vector<6x8xf32>
    %c0_44 = arith.constant 0 : index
    %c2_45 = arith.constant 2 : index
    %c0_46 = arith.constant 0 : index
    %c0_47 = arith.constant 0 : index
    %61 = vector.load %arg1[%c0_44, %c2_45, %c0_46, %c0_47] : memref<1x8x8x8xf32, #tpu.memory_space<vmem>>, vector<1x1x6x8xf32>
    %62 = vector.shape_cast %61 : vector<1x1x6x8xf32> to vector<6x8xf32>
    %63 = vector.broadcast %3 : f32 to vector<6x8xf32>
    %64 = arith.mulf %62, %63 : vector<6x8xf32>
    %65 = arith.addf %60, %64 : vector<6x8xf32>
    %c0_48 = arith.constant 0 : index
    %c2_49 = arith.constant 2 : index
    %c1_50 = arith.constant 1 : index
    %c0_51 = arith.constant 0 : index
    %66 = vector.load %arg1[%c0_48, %c2_49, %c1_50, %c0_51] : memref<1x8x8x8xf32, #tpu.memory_space<vmem>>, vector<1x1x6x8xf32>
    %67 = vector.shape_cast %66 : vector<1x1x6x8xf32> to vector<6x8xf32>
    %68 = vector.broadcast %4 : f32 to vector<6x8xf32>
    %69 = arith.mulf %67, %68 : vector<6x8xf32>
    %70 = arith.addf %65, %69 : vector<6x8xf32>
    %c0_52 = arith.constant 0 : index
    %c2_53 = arith.constant 2 : index
    %c2_54 = arith.constant 2 : index
    %c0_55 = arith.constant 0 : index
    %71 = vector.load %arg1[%c0_52, %c2_53, %c2_54, %c0_55] : memref<1x8x8x8xf32, #tpu.memory_space<vmem>>, vector<1x1x6x8xf32>
    %72 = vector.shape_cast %71 : vector<1x1x6x8xf32> to vector<6x8xf32>
    %73 = vector.broadcast %5 : f32 to vector<6x8xf32>
    %74 = arith.mulf %72, %73 : vector<6x8xf32>
    %75 = arith.addf %70, %74 : vector<6x8xf32>
    %76 = vector.broadcast %2 : f32 to vector<6x8xf32>
    %77 = arith.addf %75, %76 : vector<6x8xf32>
    %cst_56 = arith.constant 0.000000e+00 : f32
    %78 = vector.broadcast %cst_56 : f32 to vector<6x8xf32>
    %79 = arith.maximumf %77, %78 : vector<6x8xf32>
    %80 = vector.shape_cast %79 : vector<6x8xf32> to vector<6x8x1xf32>
    %81 = vector.broadcast %80 : vector<6x8x1xf32> to vector<6x8x128xf32>
    %82 = vector.broadcast %0 : vector<1x1x128xf32> to vector<6x8x128xf32>
    %83 = arith.mulf %81, %82 : vector<6x8x128xf32>
    %84 = vector.broadcast %1 : vector<1x1x128xf32> to vector<6x8x128xf32>
    %85 = arith.addf %83, %84 : vector<6x8x128xf32>
    %c12 = arith.constant 12 : index
    %c0_57 = arith.constant 0 : index
    %c0_58 = arith.constant 0 : index
    %86 = vector.load %arg21[%c12, %c0_57, %c0_58] : memref<48x8x128xf32, #tpu.memory_space<vmem>>, vector<6x8x128xf32>
    tpu.vector_store %arg21[%c12, %c0_57, %c0_58], %85 {strides = array<i32>} : memref<48x8x128xf32, #tpu.memory_space<vmem>>, vector<6x8x128xf32>,
    %cst_59 = arith.constant 0.000000e+00 : f32
    %87 = vector.broadcast %cst_59 : f32 to vector<6x8xf32>
    %c0_60 = arith.constant 0 : index
    %c3 = arith.constant 3 : index
    %c0_61 = arith.constant 0 : index
    %c0_62 = arith.constant 0 : index
    %88 = vector.load %arg1[%c0_60, %c3, %c0_61, %c0_62] : memref<1x8x8x8xf32, #tpu.memory_space<vmem>>, vector<1x1x6x8xf32>
    %89 = vector.shape_cast %88 : vector<1x1x6x8xf32> to vector<6x8xf32>
    %90 = vector.broadcast %3 : f32 to vector<6x8xf32>
    %91 = arith.mulf %89, %90 : vector<6x8xf32>
    %92 = arith.addf %87, %91 : vector<6x8xf32>
    %c0_63 = arith.constant 0 : index
    %c3_64 = arith.constant 3 : index
    %c1_65 = arith.constant 1 : index
    %c0_66 = arith.constant 0 : index
    %93 = vector.load %arg1[%c0_63, %c3_64, %c1_65, %c0_66] : memref<1x8x8x8xf32, #tpu.memory_space<vmem>>, vector<1x1x6x8xf32>
    %94 = vector.shape_cast %93 : vector<1x1x6x8xf32> to vector<6x8xf32>
    %95 = vector.broadcast %4 : f32 to vector<6x8xf32>
    %96 = arith.mulf %94, %95 : vector<6x8xf32>
    %97 = arith.addf %92, %96 : vector<6x8xf32>
    %c0_67 = arith.constant 0 : index
    %c3_68 = arith.constant 3 : index
    %c2_69 = arith.constant 2 : index
    %c0_70 = arith.constant 0 : index
    %98 = vector.load %arg1[%c0_67, %c3_68, %c2_69, %c0_70] : memref<1x8x8x8xf32, #tpu.memory_space<vmem>>, vector<1x1x6x8xf32>
    %99 = vector.shape_cast %98 : vector<1x1x6x8xf32> to vector<6x8xf32>
    %100 = vector.broadcast %5 : f32 to vector<6x8xf32>
    %101 = arith.mulf %99, %100 : vector<6x8xf32>
    %102 = arith.addf %97, %101 : vector<6x8xf32>
    %103 = vector.broadcast %2 : f32 to vector<6x8xf32>
    %104 = arith.addf %102, %103 : vector<6x8xf32>
    %cst_71 = arith.constant 0.000000e+00 : f32
    %105 = vector.broadcast %cst_71 : f32 to vector<6x8xf32>
    %106 = arith.maximumf %104, %105 : vector<6x8xf32>
    %107 = vector.shape_cast %106 : vector<6x8xf32> to vector<6x8x1xf32>
    %108 = vector.broadcast %107 : vector<6x8x1xf32> to vector<6x8x128xf32>
    %109 = vector.broadcast %0 : vector<1x1x128xf32> to vector<6x8x128xf32>
    %110 = arith.mulf %108, %109 : vector<6x8x128xf32>
    %111 = vector.broadcast %1 : vector<1x1x128xf32> to vector<6x8x128xf32>
    %112 = arith.addf %110, %111 : vector<6x8x128xf32>
    %c18 = arith.constant 18 : index
    %c0_72 = arith.constant 0 : index
    %c0_73 = arith.constant 0 : index
    %113 = vector.load %arg21[%c18, %c0_72, %c0_73] : memref<48x8x128xf32, #tpu.memory_space<vmem>>, vector<6x8x128xf32>
    tpu.vector_store %arg21[%c18, %c0_72, %c0_73], %112 {strides = array<i32>} : memref<48x8x128xf32, #tpu.memory_space<vmem>>, vector<6x8x128xf32>,
    %cst_74 = arith.constant 0.000000e+00 : f32
    %114 = vector.broadcast %cst_74 : f32 to vector<6x8xf32>
    %c0_75 = arith.constant 0 : index
    %c4 = arith.constant 4 : index
    %c0_76 = arith.constant 0 : index
    %c0_77 = arith.constant 0 : index
    %115 = vector.load %arg1[%c0_75, %c4, %c0_76, %c0_77] : memref<1x8x8x8xf32, #tpu.memory_space<vmem>>, vector<1x1x6x8xf32>
    %116 = vector.shape_cast %115 : vector<1x1x6x8xf32> to vector<6x8xf32>
    %117 = vector.broadcast %3 : f32 to vector<6x8xf32>
    %118 = arith.mulf %116, %117 : vector<6x8xf32>
    %119 = arith.addf %114, %118 : vector<6x8xf32>
    %c0_78 = arith.constant 0 : index
    %c4_79 = arith.constant 4 : index
    %c1_80 = arith.constant 1 : index
    %c0_81 = arith.constant 0 : index
    %120 = vector.load %arg1[%c0_78, %c4_79, %c1_80, %c0_81] : memref<1x8x8x8xf32, #tpu.memory_space<vmem>>, vector<1x1x6x8xf32>
    %121 = vector.shape_cast %120 : vector<1x1x6x8xf32> to vector<6x8xf32>
    %122 = vector.broadcast %4 : f32 to vector<6x8xf32>
    %123 = arith.mulf %121, %122 : vector<6x8xf32>
    %124 = arith.addf %119, %123 : vector<6x8xf32>
    %c0_82 = arith.constant 0 : index
    %c4_83 = arith.constant 4 : index
    %c2_84 = arith.constant 2 : index
    %c0_85 = arith.constant 0 : index
    %125 = vector.load %arg1[%c0_82, %c4_83, %c2_84, %c0_85] : memref<1x8x8x8xf32, #tpu.memory_space<vmem>>, vector<1x1x6x8xf32>
    %126 = vector.shape_cast %125 : vector<1x1x6x8xf32> to vector<6x8xf32>
    %127 = vector.broadcast %5 : f32 to vector<6x8xf32>
    %128 = arith.mulf %126, %127 : vector<6x8xf32>
    %129 = arith.addf %124, %128 : vector<6x8xf32>
    %130 = vector.broadcast %2 : f32 to vector<6x8xf32>
    %131 = arith.addf %129, %130 : vector<6x8xf32>
    %cst_86 = arith.constant 0.000000e+00 : f32
    %132 = vector.broadcast %cst_86 : f32 to vector<6x8xf32>
    %133 = arith.maximumf %131, %132 : vector<6x8xf32>
    %134 = vector.shape_cast %133 : vector<6x8xf32> to vector<6x8x1xf32>
    %135 = vector.broadcast %134 : vector<6x8x1xf32> to vector<6x8x128xf32>
    %136 = vector.broadcast %0 : vector<1x1x128xf32> to vector<6x8x128xf32>
    %137 = arith.mulf %135, %136 : vector<6x8x128xf32>
    %138 = vector.broadcast %1 : vector<1x1x128xf32> to vector<6x8x128xf32>
    %139 = arith.addf %137, %138 : vector<6x8x128xf32>
    %c24 = arith.constant 24 : index
    %c0_87 = arith.constant 0 : index
    %c0_88 = arith.constant 0 : index
    %140 = vector.load %arg21[%c24, %c0_87, %c0_88] : memref<48x8x128xf32, #tpu.memory_space<vmem>>, vector<6x8x128xf32>
    tpu.vector_store %arg21[%c24, %c0_87, %c0_88], %139 {strides = array<i32>} : memref<48x8x128xf32, #tpu.memory_space<vmem>>, vector<6x8x128xf32>,
    %cst_89 = arith.constant 0.000000e+00 : f32
    %141 = vector.broadcast %cst_89 : f32 to vector<6x8xf32>
    %c0_90 = arith.constant 0 : index
    %c5 = arith.constant 5 : index
    %c0_91 = arith.constant 0 : index
    %c0_92 = arith.constant 0 : index
    %142 = vector.load %arg1[%c0_90, %c5, %c0_91, %c0_92] : memref<1x8x8x8xf32, #tpu.memory_space<vmem>>, vector<1x1x6x8xf32>
    %143 = vector.shape_cast %142 : vector<1x1x6x8xf32> to vector<6x8xf32>
    %144 = vector.broadcast %3 : f32 to vector<6x8xf32>
    %145 = arith.mulf %143, %144 : vector<6x8xf32>
    %146 = arith.addf %141, %145 : vector<6x8xf32>
    %c0_93 = arith.constant 0 : index
    %c5_94 = arith.constant 5 : index
    %c1_95 = arith.constant 1 : index
    %c0_96 = arith.constant 0 : index
    %147 = vector.load %arg1[%c0_93, %c5_94, %c1_95, %c0_96] : memref<1x8x8x8xf32, #tpu.memory_space<vmem>>, vector<1x1x6x8xf32>
    %148 = vector.shape_cast %147 : vector<1x1x6x8xf32> to vector<6x8xf32>
    %149 = vector.broadcast %4 : f32 to vector<6x8xf32>
    %150 = arith.mulf %148, %149 : vector<6x8xf32>
    %151 = arith.addf %146, %150 : vector<6x8xf32>
    %c0_97 = arith.constant 0 : index
    %c5_98 = arith.constant 5 : index
    %c2_99 = arith.constant 2 : index
    %c0_100 = arith.constant 0 : index
    %152 = vector.load %arg1[%c0_97, %c5_98, %c2_99, %c0_100] : memref<1x8x8x8xf32, #tpu.memory_space<vmem>>, vector<1x1x6x8xf32>
    %153 = vector.shape_cast %152 : vector<1x1x6x8xf32> to vector<6x8xf32>
    %154 = vector.broadcast %5 : f32 to vector<6x8xf32>
    %155 = arith.mulf %153, %154 : vector<6x8xf32>
    %156 = arith.addf %151, %155 : vector<6x8xf32>
    %157 = vector.broadcast %2 : f32 to vector<6x8xf32>
    %158 = arith.addf %156, %157 : vector<6x8xf32>
    %cst_101 = arith.constant 0.000000e+00 : f32
    %159 = vector.broadcast %cst_101 : f32 to vector<6x8xf32>
    %160 = arith.maximumf %158, %159 : vector<6x8xf32>
    %161 = vector.shape_cast %160 : vector<6x8xf32> to vector<6x8x1xf32>
    %162 = vector.broadcast %161 : vector<6x8x1xf32> to vector<6x8x128xf32>
    %163 = vector.broadcast %0 : vector<1x1x128xf32> to vector<6x8x128xf32>
    %164 = arith.mulf %162, %163 : vector<6x8x128xf32>
    %165 = vector.broadcast %1 : vector<1x1x128xf32> to vector<6x8x128xf32>
    %166 = arith.addf %164, %165 : vector<6x8x128xf32>
    %c30 = arith.constant 30 : index
    %c0_102 = arith.constant 0 : index
    %c0_103 = arith.constant 0 : index
    %167 = vector.load %arg21[%c30, %c0_102, %c0_103] : memref<48x8x128xf32, #tpu.memory_space<vmem>>, vector<6x8x128xf32>
    tpu.vector_store %arg21[%c30, %c0_102, %c0_103], %166 {strides = array<i32>} : memref<48x8x128xf32, #tpu.memory_space<vmem>>, vector<6x8x128xf32>,
    %cst_104 = arith.constant 0.000000e+00 : f32
    %168 = vector.broadcast %cst_104 : f32 to vector<6x8xf32>
    %c0_105 = arith.constant 0 : index
    %c6_106 = arith.constant 6 : index
    %c0_107 = arith.constant 0 : index
    %c0_108 = arith.constant 0 : index
    %169 = vector.load %arg1[%c0_105, %c6_106, %c0_107, %c0_108] : memref<1x8x8x8xf32, #tpu.memory_space<vmem>>, vector<1x1x6x8xf32>
    %170 = vector.shape_cast %169 : vector<1x1x6x8xf32> to vector<6x8xf32>
    %171 = vector.broadcast %3 : f32 to vector<6x8xf32>
    %172 = arith.mulf %170, %171 : vector<6x8xf32>
    %173 = arith.addf %168, %172 : vector<6x8xf32>
    %c0_109 = arith.constant 0 : index
    %c6_110 = arith.constant 6 : index
    %c1_111 = arith.constant 1 : index
    %c0_112 = arith.constant 0 : index
    %174 = vector.load %arg1[%c0_109, %c6_110, %c1_111, %c0_112] : memref<1x8x8x8xf32, #tpu.memory_space<vmem>>, vector<1x1x6x8xf32>
    %175 = vector.shape_cast %174 : vector<1x1x6x8xf32> to vector<6x8xf32>
    %176 = vector.broadcast %4 : f32 to vector<6x8xf32>
    %177 = arith.mulf %175, %176 : vector<6x8xf32>
    %178 = arith.addf %173, %177 : vector<6x8xf32>
    %c0_113 = arith.constant 0 : index
    %c6_114 = arith.constant 6 : index
    %c2_115 = arith.constant 2 : index
    %c0_116 = arith.constant 0 : index
    %179 = vector.load %arg1[%c0_113, %c6_114, %c2_115, %c0_116] : memref<1x8x8x8xf32, #tpu.memory_space<vmem>>, vector<1x1x6x8xf32>
    %180 = vector.shape_cast %179 : vector<1x1x6x8xf32> to vector<6x8xf32>
    %181 = vector.broadcast %5 : f32 to vector<6x8xf32>
    %182 = arith.mulf %180, %181 : vector<6x8xf32>
    %183 = arith.addf %178, %182 : vector<6x8xf32>
    %184 = vector.broadcast %2 : f32 to vector<6x8xf32>
    %185 = arith.addf %183, %184 : vector<6x8xf32>
    %cst_117 = arith.constant 0.000000e+00 : f32
    %186 = vector.broadcast %cst_117 : f32 to vector<6x8xf32>
    %187 = arith.maximumf %185, %186 : vector<6x8xf32>
    %188 = vector.shape_cast %187 : vector<6x8xf32> to vector<6x8x1xf32>
    %189 = vector.broadcast %188 : vector<6x8x1xf32> to vector<6x8x128xf32>
    %190 = vector.broadcast %0 : vector<1x1x128xf32> to vector<6x8x128xf32>
    %191 = arith.mulf %189, %190 : vector<6x8x128xf32>
    %192 = vector.broadcast %1 : vector<1x1x128xf32> to vector<6x8x128xf32>
    %193 = arith.addf %191, %192 : vector<6x8x128xf32>
    %c36 = arith.constant 36 : index
    %c0_118 = arith.constant 0 : index
    %c0_119 = arith.constant 0 : index
    %194 = vector.load %arg21[%c36, %c0_118, %c0_119] : memref<48x8x128xf32, #tpu.memory_space<vmem>>, vector<6x8x128xf32>
    tpu.vector_store %arg21[%c36, %c0_118, %c0_119], %193 {strides = array<i32>} : memref<48x8x128xf32, #tpu.memory_space<vmem>>, vector<6x8x128xf32>,
    %cst_120 = arith.constant 0.000000e+00 : f32
    %195 = vector.broadcast %cst_120 : f32 to vector<6x8xf32>
    %c0_121 = arith.constant 0 : index
    %c7 = arith.constant 7 : index
    %c0_122 = arith.constant 0 : index
    %c0_123 = arith.constant 0 : index
    %196 = vector.load %arg1[%c0_121, %c7, %c0_122, %c0_123] : memref<1x8x8x8xf32, #tpu.memory_space<vmem>>, vector<1x1x6x8xf32>
    %197 = vector.shape_cast %196 : vector<1x1x6x8xf32> to vector<6x8xf32>
    %198 = vector.broadcast %3 : f32 to vector<6x8xf32>
    %199 = arith.mulf %197, %198 : vector<6x8xf32>
    %200 = arith.addf %195, %199 : vector<6x8xf32>
    %c0_124 = arith.constant 0 : index
    %c7_125 = arith.constant 7 : index
    %c1_126 = arith.constant 1 : index
    %c0_127 = arith.constant 0 : index
    %201 = vector.load %arg1[%c0_124, %c7_125, %c1_126, %c0_127] : memref<1x8x8x8xf32, #tpu.memory_space<vmem>>, vector<1x1x6x8xf32>
    %202 = vector.shape_cast %201 : vector<1x1x6x8xf32> to vector<6x8xf32>
    %203 = vector.broadcast %4 : f32 to vector<6x8xf32>
    %204 = arith.mulf %202, %203 : vector<6x8xf32>
    %205 = arith.addf %200, %204 : vector<6x8xf32>
    %c0_128 = arith.constant 0 : index
    %c7_129 = arith.constant 7 : index
    %c2_130 = arith.constant 2 : index
    %c0_131 = arith.constant 0 : index
    %206 = vector.load %arg1[%c0_128, %c7_129, %c2_130, %c0_131] : memref<1x8x8x8xf32, #tpu.memory_space<vmem>>, vector<1x1x6x8xf32>
    %207 = vector.shape_cast %206 : vector<1x1x6x8xf32> to vector<6x8xf32>
    %208 = vector.broadcast %5 : f32 to vector<6x8xf32>
    %209 = arith.mulf %207, %208 : vector<6x8xf32>
    %210 = arith.addf %205, %209 : vector<6x8xf32>
    %211 = vector.broadcast %2 : f32 to vector<6x8xf32>
    %212 = arith.addf %210, %211 : vector<6x8xf32>
    %cst_132 = arith.constant 0.000000e+00 : f32
    %213 = vector.broadcast %cst_132 : f32 to vector<6x8xf32>
    %214 = arith.maximumf %212, %213 : vector<6x8xf32>
    %215 = vector.shape_cast %214 : vector<6x8xf32> to vector<6x8x1xf32>
    %216 = vector.broadcast %215 : vector<6x8x1xf32> to vector<6x8x128xf32>
    %217 = vector.broadcast %0 : vector<1x1x128xf32> to vector<6x8x128xf32>
    %218 = arith.mulf %216, %217 : vector<6x8x128xf32>
    %219 = vector.broadcast %1 : vector<1x1x128xf32> to vector<6x8x128xf32>
    %220 = arith.addf %218, %219 : vector<6x8x128xf32>
    %c42 = arith.constant 42 : index
    %c0_133 = arith.constant 0 : index
    %c0_134 = arith.constant 0 : index
    %221 = vector.load %arg21[%c42, %c0_133, %c0_134] : memref<48x8x128xf32, #tpu.memory_space<vmem>>, vector<6x8x128xf32>
    tpu.vector_store %arg21[%c42, %c0_133, %c0_134], %220 {strides = array<i32>} : memref<48x8x128xf32, #tpu.memory_space<vmem>>, vector<6x8x128xf32>,
    %c0_135 = arith.constant 0 : index
    %c0_136 = arith.constant 0 : index
    %222 = vector.load %arg7[%c0_135, %c0_136] : memref<32x128xf32, #tpu.memory_space<vmem>>, vector<32x128xf32>
    %cst_137 = arith.constant 0.000000e+00 : f32
    %223 = vector.broadcast %cst_137 : f32 to vector<8x32xf32>
    %cst_138 = arith.constant 0.000000e+00 : f32
    %224 = vector.broadcast %cst_138 : f32 to vector<8x32xf32>
    %c0_i32 = arith.constant 0 : i32
    %c6_i32 = arith.constant 6 : i32
    %225 = arith.addi %c0_i32, %c6_i32 : i32
    %c1_i32 = arith.constant 1 : i32
    %226:2 = scf.for %arg22 = %c0_i32 to %225 step %c1_i32 iter_args(%arg23 = %223, %arg24 = %224) -> (vector<8x32xf32>, vector<8x32xf32>)  : i32 {
      %c8_i32 = arith.constant 8 : i32
      %270 = arith.muli %arg22, %c8_i32 : i32
      %cst_175 = arith.constant dense<0.000000e+00> : vector<8x128xf32>
      %271 = tpu.matmul %arg23, %222, %cst_175 {dimension_numbers = #tpu.dot_dimension_numbers<[1], [0], [0], [1], [0, 0, 1, 1], [], []>} : vector<8x32xf32>, vector<32x128xf32>, vector<8x128xf32> -> vector<8x128xf32>
      %c0_i32_176 = arith.constant 0 : i32
      %272 = arith.addi %270, %c0_i32_176 : i32
      %273 = arith.index_cast %272 : i32 to index
      %c0_177 = arith.constant 0 : index
      %c0_178 = arith.constant 0 : index
      %274 = vector.load %arg21[%273, %c0_177, %c0_178] : memref<48x8x128xf32, #tpu.memory_space<vmem>>, vector<1x8x128xf32>
      %275 = vector.shape_cast %274 : vector<1x8x128xf32> to vector<8x128xf32>
      %276 = arith.addf %271, %275 : vector<8x128xf32>
      %277 = arith.negf %276 : vector<8x128xf32>
      %278 = math.exp %277 : vector<8x128xf32>
      %cst_179 = arith.constant 1.000000e+00 : f32
      %279 = vector.broadcast %cst_179 : f32 to vector<8x128xf32>
      %280 = arith.addf %279, %278 : vector<8x128xf32>
      %281 = arith.divf %279, %280 : vector<8x128xf32>
      %282 = math.tanh %276 : vector<8x128xf32>
      %283 = vector.extract_strided_slice %281 {offsets = [0, 0], sizes = [8, 32], strides = [1, 1]} : vector<8x128xf32> to vector<8x32xf32>
      %284 = vector.extract_strided_slice %281 {offsets = [0, 32], sizes = [8, 32], strides = [1, 1]} : vector<8x128xf32> to vector<8x32xf32>
      %285 = vector.extract_strided_slice %282 {offsets = [0, 64], sizes = [8, 32], strides = [1, 1]} : vector<8x128xf32> to vector<8x32xf32>
      %286 = vector.extract_strided_slice %281 {offsets = [0, 96], sizes = [8, 32], strides = [1, 1]} : vector<8x128xf32> to vector<8x32xf32>
      %287 = arith.mulf %284, %arg24 : vector<8x32xf32>
      %288 = arith.mulf %283, %285 : vector<8x32xf32>
      %289 = arith.addf %287, %288 : vector<8x32xf32>
      %290 = math.tanh %289 : vector<8x32xf32>
      %291 = arith.mulf %286, %290 : vector<8x32xf32>
      %cst_180 = arith.constant dense<0.000000e+00> : vector<8x128xf32>
      %292 = tpu.matmul %291, %222, %cst_180 {dimension_numbers = #tpu.dot_dimension_numbers<[1], [0], [0], [1], [0, 0, 1, 1], [], []>} : vector<8x32xf32>, vector<32x128xf32>, vector<8x128xf32> -> vector<8x128xf32>
      %c1_i32_181 = arith.constant 1 : i32
      %293 = arith.addi %270, %c1_i32_181 : i32
      %294 = arith.index_cast %293 : i32 to index
      %c0_182 = arith.constant 0 : index
      %c0_183 = arith.constant 0 : index
      %295 = vector.load %arg21[%294, %c0_182, %c0_183] : memref<48x8x128xf32, #tpu.memory_space<vmem>>, vector<1x8x128xf32>
      %296 = vector.shape_cast %295 : vector<1x8x128xf32> to vector<8x128xf32>
      %297 = arith.addf %292, %296 : vector<8x128xf32>
      %298 = arith.negf %297 : vector<8x128xf32>
      %299 = math.exp %298 : vector<8x128xf32>
      %cst_184 = arith.constant 1.000000e+00 : f32
      %300 = vector.broadcast %cst_184 : f32 to vector<8x128xf32>
      %301 = arith.addf %300, %299 : vector<8x128xf32>
      %302 = arith.divf %300, %301 : vector<8x128xf32>
      %303 = math.tanh %297 : vector<8x128xf32>
      %304 = vector.extract_strided_slice %302 {offsets = [0, 0], sizes = [8, 32], strides = [1, 1]} : vector<8x128xf32> to vector<8x32xf32>
      %305 = vector.extract_strided_slice %302 {offsets = [0, 32], sizes = [8, 32], strides = [1, 1]} : vector<8x128xf32> to vector<8x32xf32>
      %306 = vector.extract_strided_slice %303 {offsets = [0, 64], sizes = [8, 32], strides = [1, 1]} : vector<8x128xf32> to vector<8x32xf32>
      %307 = vector.extract_strided_slice %302 {offsets = [0, 96], sizes = [8, 32], strides = [1, 1]} : vector<8x128xf32> to vector<8x32xf32>
      %308 = arith.mulf %305, %289 : vector<8x32xf32>
      %309 = arith.mulf %304, %306 : vector<8x32xf32>
      %310 = arith.addf %308, %309 : vector<8x32xf32>
      %311 = math.tanh %310 : vector<8x32xf32>
      %312 = arith.mulf %307, %311 : vector<8x32xf32>
      %cst_185 = arith.constant dense<0.000000e+00> : vector<8x128xf32>
      %313 = tpu.matmul %312, %222, %cst_185 {dimension_numbers = #tpu.dot_dimension_numbers<[1], [0], [0], [1], [0, 0, 1, 1], [], []>} : vector<8x32xf32>, vector<32x128xf32>, vector<8x128xf32> -> vector<8x128xf32>
      %c2_i32 = arith.constant 2 : i32
      %314 = arith.addi %270, %c2_i32 : i32
      %315 = arith.index_cast %314 : i32 to index
      %c0_186 = arith.constant 0 : index
      %c0_187 = arith.constant 0 : index
      %316 = vector.load %arg21[%315, %c0_186, %c0_187] : memref<48x8x128xf32, #tpu.memory_space<vmem>>, vector<1x8x128xf32>
      %317 = vector.shape_cast %316 : vector<1x8x128xf32> to vector<8x128xf32>
      %318 = arith.addf %313, %317 : vector<8x128xf32>
      %319 = arith.negf %318 : vector<8x128xf32>
      %320 = math.exp %319 : vector<8x128xf32>
      %cst_188 = arith.constant 1.000000e+00 : f32
      %321 = vector.broadcast %cst_188 : f32 to vector<8x128xf32>
      %322 = arith.addf %321, %320 : vector<8x128xf32>
      %323 = arith.divf %321, %322 : vector<8x128xf32>
      %324 = math.tanh %318 : vector<8x128xf32>
      %325 = vector.extract_strided_slice %323 {offsets = [0, 0], sizes = [8, 32], strides = [1, 1]} : vector<8x128xf32> to vector<8x32xf32>
      %326 = vector.extract_strided_slice %323 {offsets = [0, 32], sizes = [8, 32], strides = [1, 1]} : vector<8x128xf32> to vector<8x32xf32>
      %327 = vector.extract_strided_slice %324 {offsets = [0, 64], sizes = [8, 32], strides = [1, 1]} : vector<8x128xf32> to vector<8x32xf32>
      %328 = vector.extract_strided_slice %323 {offsets = [0, 96], sizes = [8, 32], strides = [1, 1]} : vector<8x128xf32> to vector<8x32xf32>
      %329 = arith.mulf %326, %310 : vector<8x32xf32>
      %330 = arith.mulf %325, %327 : vector<8x32xf32>
      %331 = arith.addf %329, %330 : vector<8x32xf32>
      %332 = math.tanh %331 : vector<8x32xf32>
      %333 = arith.mulf %328, %332 : vector<8x32xf32>
      %cst_189 = arith.constant dense<0.000000e+00> : vector<8x128xf32>
      %334 = tpu.matmul %333, %222, %cst_189 {dimension_numbers = #tpu.dot_dimension_numbers<[1], [0], [0], [1], [0, 0, 1, 1], [], []>} : vector<8x32xf32>, vector<32x128xf32>, vector<8x128xf32> -> vector<8x128xf32>
      %c3_i32 = arith.constant 3 : i32
      %335 = arith.addi %270, %c3_i32 : i32
      %336 = arith.index_cast %335 : i32 to index
      %c0_190 = arith.constant 0 : index
      %c0_191 = arith.constant 0 : index
      %337 = vector.load %arg21[%336, %c0_190, %c0_191] : memref<48x8x128xf32, #tpu.memory_space<vmem>>, vector<1x8x128xf32>
      %338 = vector.shape_cast %337 : vector<1x8x128xf32> to vector<8x128xf32>
      %339 = arith.addf %334, %338 : vector<8x128xf32>
      %340 = arith.negf %339 : vector<8x128xf32>
      %341 = math.exp %340 : vector<8x128xf32>
      %cst_192 = arith.constant 1.000000e+00 : f32
      %342 = vector.broadcast %cst_192 : f32 to vector<8x128xf32>
      %343 = arith.addf %342, %341 : vector<8x128xf32>
      %344 = arith.divf %342, %343 : vector<8x128xf32>
      %345 = math.tanh %339 : vector<8x128xf32>
      %346 = vector.extract_strided_slice %344 {offsets = [0, 0], sizes = [8, 32], strides = [1, 1]} : vector<8x128xf32> to vector<8x32xf32>
      %347 = vector.extract_strided_slice %344 {offsets = [0, 32], sizes = [8, 32], strides = [1, 1]} : vector<8x128xf32> to vector<8x32xf32>
      %348 = vector.extract_strided_slice %345 {offsets = [0, 64], sizes = [8, 32], strides = [1, 1]} : vector<8x128xf32> to vector<8x32xf32>
      %349 = vector.extract_strided_slice %344 {offsets = [0, 96], sizes = [8, 32], strides = [1, 1]} : vector<8x128xf32> to vector<8x32xf32>
      %350 = arith.mulf %347, %331 : vector<8x32xf32>
      %351 = arith.mulf %346, %348 : vector<8x32xf32>
      %352 = arith.addf %350, %351 : vector<8x32xf32>
      %353 = math.tanh %352 : vector<8x32xf32>
      %354 = arith.mulf %349, %353 : vector<8x32xf32>
      %cst_193 = arith.constant dense<0.000000e+00> : vector<8x128xf32>
      %355 = tpu.matmul %354, %222, %cst_193 {dimension_numbers = #tpu.dot_dimension_numbers<[1], [0], [0], [1], [0, 0, 1, 1], [], []>} : vector<8x32xf32>, vector<32x128xf32>, vector<8x128xf32> -> vector<8x128xf32>
      %c4_i32 = arith.constant 4 : i32
      %356 = arith.addi %270, %c4_i32 : i32
      %357 = arith.index_cast %356 : i32 to index
      %c0_194 = arith.constant 0 : index
      %c0_195 = arith.constant 0 : index
      %358 = vector.load %arg21[%357, %c0_194, %c0_195] : memref<48x8x128xf32, #tpu.memory_space<vmem>>, vector<1x8x128xf32>
      %359 = vector.shape_cast %358 : vector<1x8x128xf32> to vector<8x128xf32>
      %360 = arith.addf %355, %359 : vector<8x128xf32>
      %361 = arith.negf %360 : vector<8x128xf32>
      %362 = math.exp %361 : vector<8x128xf32>
      %cst_196 = arith.constant 1.000000e+00 : f32
      %363 = vector.broadcast %cst_196 : f32 to vector<8x128xf32>
      %364 = arith.addf %363, %362 : vector<8x128xf32>
      %365 = arith.divf %363, %364 : vector<8x128xf32>
      %366 = math.tanh %360 : vector<8x128xf32>
      %367 = vector.extract_strided_slice %365 {offsets = [0, 0], sizes = [8, 32], strides = [1, 1]} : vector<8x128xf32> to vector<8x32xf32>
      %368 = vector.extract_strided_slice %365 {offsets = [0, 32], sizes = [8, 32], strides = [1, 1]} : vector<8x128xf32> to vector<8x32xf32>
      %369 = vector.extract_strided_slice %366 {offsets = [0, 64], sizes = [8, 32], strides = [1, 1]} : vector<8x128xf32> to vector<8x32xf32>
      %370 = vector.extract_strided_slice %365 {offsets = [0, 96], sizes = [8, 32], strides = [1, 1]} : vector<8x128xf32> to vector<8x32xf32>
      %371 = arith.mulf %368, %352 : vector<8x32xf32>
      %372 = arith.mulf %367, %369 : vector<8x32xf32>
      %373 = arith.addf %371, %372 : vector<8x32xf32>
      %374 = math.tanh %373 : vector<8x32xf32>
      %375 = arith.mulf %370, %374 : vector<8x32xf32>
      %cst_197 = arith.constant dense<0.000000e+00> : vector<8x128xf32>
      %376 = tpu.matmul %375, %222, %cst_197 {dimension_numbers = #tpu.dot_dimension_numbers<[1], [0], [0], [1], [0, 0, 1, 1], [], []>} : vector<8x32xf32>, vector<32x128xf32>, vector<8x128xf32> -> vector<8x128xf32>
      %c5_i32 = arith.constant 5 : i32
      %377 = arith.addi %270, %c5_i32 : i32
      %378 = arith.index_cast %377 : i32 to index
      %c0_198 = arith.constant 0 : index
      %c0_199 = arith.constant 0 : index
      %379 = vector.load %arg21[%378, %c0_198, %c0_199] : memref<48x8x128xf32, #tpu.memory_space<vmem>>, vector<1x8x128xf32>
      %380 = vector.shape_cast %379 : vector<1x8x128xf32> to vector<8x128xf32>
      %381 = arith.addf %376, %380 : vector<8x128xf32>
      %382 = arith.negf %381 : vector<8x128xf32>
      %383 = math.exp %382 : vector<8x128xf32>
      %cst_200 = arith.constant 1.000000e+00 : f32
      %384 = vector.broadcast %cst_200 : f32 to vector<8x128xf32>
      %385 = arith.addf %384, %383 : vector<8x128xf32>
      %386 = arith.divf %384, %385 : vector<8x128xf32>
      %387 = math.tanh %381 : vector<8x128xf32>
      %388 = vector.extract_strided_slice %386 {offsets = [0, 0], sizes = [8, 32], strides = [1, 1]} : vector<8x128xf32> to vector<8x32xf32>
      %389 = vector.extract_strided_slice %386 {offsets = [0, 32], sizes = [8, 32], strides = [1, 1]} : vector<8x128xf32> to vector<8x32xf32>
      %390 = vector.extract_strided_slice %387 {offsets = [0, 64], sizes = [8, 32], strides = [1, 1]} : vector<8x128xf32> to vector<8x32xf32>
      %391 = vector.extract_strided_slice %386 {offsets = [0, 96], sizes = [8, 32], strides = [1, 1]} : vector<8x128xf32> to vector<8x32xf32>
      %392 = arith.mulf %389, %373 : vector<8x32xf32>
      %393 = arith.mulf %388, %390 : vector<8x32xf32>
      %394 = arith.addf %392, %393 : vector<8x32xf32>
      %395 = math.tanh %394 : vector<8x32xf32>
      %396 = arith.mulf %391, %395 : vector<8x32xf32>
      %cst_201 = arith.constant dense<0.000000e+00> : vector<8x128xf32>
      %397 = tpu.matmul %396, %222, %cst_201 {dimension_numbers = #tpu.dot_dimension_numbers<[1], [0], [0], [1], [0, 0, 1, 1], [], []>} : vector<8x32xf32>, vector<32x128xf32>, vector<8x128xf32> -> vector<8x128xf32>
      %c6_i32_202 = arith.constant 6 : i32
      %398 = arith.addi %270, %c6_i32_202 : i32
      %399 = arith.index_cast %398 : i32 to index
      %c0_203 = arith.constant 0 : index
      %c0_204 = arith.constant 0 : index
      %400 = vector.load %arg21[%399, %c0_203, %c0_204] : memref<48x8x128xf32, #tpu.memory_space<vmem>>, vector<1x8x128xf32>
      %401 = vector.shape_cast %400 : vector<1x8x128xf32> to vector<8x128xf32>
      %402 = arith.addf %397, %401 : vector<8x128xf32>
      %403 = arith.negf %402 : vector<8x128xf32>
      %404 = math.exp %403 : vector<8x128xf32>
      %cst_205 = arith.constant 1.000000e+00 : f32
      %405 = vector.broadcast %cst_205 : f32 to vector<8x128xf32>
      %406 = arith.addf %405, %404 : vector<8x128xf32>
      %407 = arith.divf %405, %406 : vector<8x128xf32>
      %408 = math.tanh %402 : vector<8x128xf32>
      %409 = vector.extract_strided_slice %407 {offsets = [0, 0], sizes = [8, 32], strides = [1, 1]} : vector<8x128xf32> to vector<8x32xf32>
      %410 = vector.extract_strided_slice %407 {offsets = [0, 32], sizes = [8, 32], strides = [1, 1]} : vector<8x128xf32> to vector<8x32xf32>
      %411 = vector.extract_strided_slice %408 {offsets = [0, 64], sizes = [8, 32], strides = [1, 1]} : vector<8x128xf32> to vector<8x32xf32>
      %412 = vector.extract_strided_slice %407 {offsets = [0, 96], sizes = [8, 32], strides = [1, 1]} : vector<8x128xf32> to vector<8x32xf32>
      %413 = arith.mulf %410, %394 : vector<8x32xf32>
      %414 = arith.mulf %409, %411 : vector<8x32xf32>
      %415 = arith.addf %413, %414 : vector<8x32xf32>
      %416 = math.tanh %415 : vector<8x32xf32>
      %417 = arith.mulf %412, %416 : vector<8x32xf32>
      %cst_206 = arith.constant dense<0.000000e+00> : vector<8x128xf32>
      %418 = tpu.matmul %417, %222, %cst_206 {dimension_numbers = #tpu.dot_dimension_numbers<[1], [0], [0], [1], [0, 0, 1, 1], [], []>} : vector<8x32xf32>, vector<32x128xf32>, vector<8x128xf32> -> vector<8x128xf32>
      %c7_i32 = arith.constant 7 : i32
      %419 = arith.addi %270, %c7_i32 : i32
      %420 = arith.index_cast %419 : i32 to index
      %c0_207 = arith.constant 0 : index
      %c0_208 = arith.constant 0 : index
      %421 = vector.load %arg21[%420, %c0_207, %c0_208] : memref<48x8x128xf32, #tpu.memory_space<vmem>>, vector<1x8x128xf32>
      %422 = vector.shape_cast %421 : vector<1x8x128xf32> to vector<8x128xf32>
      %423 = arith.addf %418, %422 : vector<8x128xf32>
      %424 = arith.negf %423 : vector<8x128xf32>
      %425 = math.exp %424 : vector<8x128xf32>
      %cst_209 = arith.constant 1.000000e+00 : f32
      %426 = vector.broadcast %cst_209 : f32 to vector<8x128xf32>
      %427 = arith.addf %426, %425 : vector<8x128xf32>
      %428 = arith.divf %426, %427 : vector<8x128xf32>
      %429 = math.tanh %423 : vector<8x128xf32>
      %430 = vector.extract_strided_slice %428 {offsets = [0, 0], sizes = [8, 32], strides = [1, 1]} : vector<8x128xf32> to vector<8x32xf32>
      %431 = vector.extract_strided_slice %428 {offsets = [0, 32], sizes = [8, 32], strides = [1, 1]} : vector<8x128xf32> to vector<8x32xf32>
      %432 = vector.extract_strided_slice %429 {offsets = [0, 64], sizes = [8, 32], strides = [1, 1]} : vector<8x128xf32> to vector<8x32xf32>
      %433 = vector.extract_strided_slice %428 {offsets = [0, 96], sizes = [8, 32], strides = [1, 1]} : vector<8x128xf32> to vector<8x32xf32>
      %434 = arith.mulf %431, %415 : vector<8x32xf32>
      %435 = arith.mulf %430, %432 : vector<8x32xf32>
      %436 = arith.addf %434, %435 : vector<8x32xf32>
      %437 = math.tanh %436 : vector<8x32xf32>
      %438 = arith.mulf %433, %437 : vector<8x32xf32>
      scf.yield %438, %436 : vector<8x32xf32>, vector<8x32xf32>
    }
    %c6_i32_139 = arith.constant 6 : i32
    %c0_140 = arith.constant 0 : index
    %c0_141 = arith.constant 0 : index
    %227 = vector.load %arg8[%c0_140, %c0_141] : memref<32x10xf32, #tpu.memory_space<vmem>>, vector<32x10xf32>
    %cst_142 = arith.constant dense<0.000000e+00> : vector<8x10xf32>
    %228 = tpu.matmul %226#0, %227, %cst_142 {dimension_numbers = #tpu.dot_dimension_numbers<[1], [0], [0], [1], [0, 0, 1, 1], [], []>} : vector<8x32xf32>, vector<32x10xf32>, vector<8x10xf32> -> vector<8x10xf32>
    %c0_143 = arith.constant 0 : index
    %c0_144 = arith.constant 0 : index
    %229 = vector.load %arg9[%c0_143, %c0_144] : memref<1x10xf32, #tpu.memory_space<vmem>>, vector<1x10xf32>
    %230 = vector.broadcast %229 : vector<1x10xf32> to vector<8x10xf32>
    %231 = arith.addf %228, %230 : vector<8x10xf32>
    %c0_145 = arith.constant 0 : index
    %c0_146 = arith.constant 0 : index
    %232 = vector.load %arg10[%c0_145, %c0_146] : memref<10x1xf32, #tpu.memory_space<vmem>>, vector<10x1xf32>
    %cst_147 = arith.constant dense<0.000000e+00> : vector<8x1xf32>
    %233 = tpu.matmul %231, %232, %cst_147 {dimension_numbers = #tpu.dot_dimension_numbers<[1], [0], [0], [1], [0, 0, 1, 1], [], []>} : vector<8x10xf32>, vector<10x1xf32>, vector<8x1xf32> -> vector<8x1xf32>
    %c0_148 = arith.constant 0 : index
    %c0_149 = arith.constant 0 : index
    %234 = vector.load %arg11[%c0_148, %c0_149] : memref<1x1xf32, #tpu.memory_space<vmem>>, vector<1x1xf32>
    %235 = vector.broadcast %234 : vector<1x1xf32> to vector<8x1xf32>
    %236 = arith.addf %233, %235 : vector<8x1xf32>
    %c0_150 = arith.constant 0 : index
    %c0_151 = arith.constant 0 : index
    %c0_152 = arith.constant 0 : index
    %237 = vector.load %arg2[%c0_150, %c0_151, %c0_152] : memref<1x8x5xf32, #tpu.memory_space<vmem>>, vector<1x8x5xf32>
    %238 = vector.shape_cast %237 : vector<1x8x5xf32> to vector<8x5xf32>
    %c0_153 = arith.constant 0 : index
    %c0_154 = arith.constant 0 : index
    %239 = vector.load %arg12[%c0_153, %c0_154] : memref<5x10xf32, #tpu.memory_space<vmem>>, vector<5x10xf32>
    %cst_155 = arith.constant dense<0.000000e+00> : vector<8x10xf32>
    %240 = tpu.matmul %238, %239, %cst_155 {dimension_numbers = #tpu.dot_dimension_numbers<[1], [0], [0], [1], [0, 0, 1, 1], [], []>} : vector<8x5xf32>, vector<5x10xf32>, vector<8x10xf32> -> vector<8x10xf32>
    %c0_156 = arith.constant 0 : index
    %c0_157 = arith.constant 0 : index
    %241 = vector.load %arg13[%c0_156, %c0_157] : memref<1x10xf32, #tpu.memory_space<vmem>>, vector<1x10xf32>
    %242 = vector.broadcast %241 : vector<1x10xf32> to vector<8x10xf32>
    %243 = arith.addf %240, %242 : vector<8x10xf32>
    %c0_158 = arith.constant 0 : index
    %c0_159 = arith.constant 0 : index
    %244 = vector.load %arg14[%c0_158, %c0_159] : memref<10x1xf32, #tpu.memory_space<vmem>>, vector<10x1xf32>
    %cst_160 = arith.constant dense<0.000000e+00> : vector<8x1xf32>
    %245 = tpu.matmul %243, %244, %cst_160 {dimension_numbers = #tpu.dot_dimension_numbers<[1], [0], [0], [1], [0, 0, 1, 1], [], []>} : vector<8x10xf32>, vector<10x1xf32>, vector<8x1xf32> -> vector<8x1xf32>
    %c0_161 = arith.constant 0 : index
    %c0_162 = arith.constant 0 : index
    %246 = vector.load %arg15[%c0_161, %c0_162] : memref<1x1xf32, #tpu.memory_space<vmem>>, vector<1x1xf32>
    %247 = vector.broadcast %246 : vector<1x1xf32> to vector<8x1xf32>
    %248 = arith.addf %245, %247 : vector<8x1xf32>
    %c0_163 = arith.constant 0 : index
    %c0_164 = arith.constant 0 : index
    %249 = vector.load %arg16[%c0_163, %c0_164] : memref<2x2xf32, #tpu.memory_space<vmem>>, vector<2x2xf32>
    %250 = vector.extract_strided_slice %249 {offsets = [0, 0], sizes = [1, 2], strides = [1, 1]} : vector<2x2xf32> to vector<1x2xf32>
    %251 = vector.broadcast %236 : vector<8x1xf32> to vector<8x2xf32>
    %252 = vector.broadcast %250 : vector<1x2xf32> to vector<8x2xf32>
    %253 = arith.mulf %251, %252 : vector<8x2xf32>
    %254 = vector.extract_strided_slice %249 {offsets = [1, 0], sizes = [1, 2], strides = [1, 1]} : vector<2x2xf32> to vector<1x2xf32>
    %255 = vector.broadcast %248 : vector<8x1xf32> to vector<8x2xf32>
    %256 = vector.broadcast %254 : vector<1x2xf32> to vector<8x2xf32>
    %257 = arith.mulf %255, %256 : vector<8x2xf32>
    %258 = arith.addf %253, %257 : vector<8x2xf32>
    %c0_165 = arith.constant 0 : index
    %c0_166 = arith.constant 0 : index
    %259 = vector.load %arg17[%c0_165, %c0_166] : memref<1x2xf32, #tpu.memory_space<vmem>>, vector<1x2xf32>
    %260 = vector.broadcast %259 : vector<1x2xf32> to vector<8x2xf32>
    %261 = arith.addf %258, %260 : vector<8x2xf32>
    %c0_167 = arith.constant 0 : index
    %c0_168 = arith.constant 0 : index
    %262 = vector.load %arg18[%c0_167, %c0_168] : memref<2x1xf32, #tpu.memory_space<vmem>>, vector<2x1xf32>
    %cst_169 = arith.constant dense<0.000000e+00> : vector<8x1xf32>
    %263 = tpu.matmul %261, %262, %cst_169 {dimension_numbers = #tpu.dot_dimension_numbers<[1], [0], [0], [1], [0, 0, 1, 1], [], []>} : vector<8x2xf32>, vector<2x1xf32>, vector<8x1xf32> -> vector<8x1xf32>
    %c0_170 = arith.constant 0 : index
    %c0_171 = arith.constant 0 : index
    %264 = vector.load %arg19[%c0_170, %c0_171] : memref<1x1xf32, #tpu.memory_space<vmem>>, vector<1x1xf32>
    %265 = vector.broadcast %264 : vector<1x1xf32> to vector<8x1xf32>
    %266 = arith.addf %263, %265 : vector<8x1xf32>
    %c0_172 = arith.constant 0 : index
    %c0_173 = arith.constant 0 : index
    %c0_174 = arith.constant 0 : index
    %267 = vector.load %arg20[%c0_172, %c0_173, %c0_174] : memref<1x8x1xf32, #tpu.memory_space<vmem>>, vector<1x8x1xf32>
    %268 = vector.shape_cast %267 : vector<1x8x1xf32> to vector<8x1xf32>
    %269 = vector.shape_cast %266 : vector<8x1xf32> to vector<1x8x1xf32>
    tpu.vector_store %arg20[%c0_172, %c0_173, %c0_174], %269 {strides = array<i32>} : memref<1x8x1xf32, #tpu.memory_space<vmem>>, vector<1x8x1xf32>,
    return
  }
  func.func @transform_0(%arg0: i32) -> (i32, i32, i32, i32) {
    %c0_i32 = arith.constant 0 : i32
    %c0_i32_0 = arith.constant 0 : i32
    %c0_i32_1 = arith.constant 0 : i32
    %c0_i32_2 = arith.constant 0 : i32
    return %arg0, %c0_i32, %c0_i32_0, %c0_i32_1 : i32, i32, i32, i32
  }
  func.func @transform_1(%arg0: i32) -> (i32, i32, i32) {
    %c0_i32 = arith.constant 0 : i32
    %c0_i32_0 = arith.constant 0 : i32
    %c0_i32_1 = arith.constant 0 : i32
    return %arg0, %c0_i32, %c0_i32_0 : i32, i32, i32
  }
  func.func @transform_2(%arg0: i32) -> (i32, i32) {
    %c0_i32 = arith.constant 0 : i32
    %c0_i32_0 = arith.constant 0 : i32
    %c0_i32_1 = arith.constant 0 : i32
    return %c0_i32, %c0_i32_0 : i32, i32
  }
  func.func @transform_3(%arg0: i32) -> (i32, i32) {
    %c0_i32 = arith.constant 0 : i32
    %c0_i32_0 = arith.constant 0 : i32
    %c0_i32_1 = arith.constant 0 : i32
    return %c0_i32, %c0_i32_0 : i32, i32
  }
  func.func @transform_4(%arg0: i32) -> (i32, i32, i32) {
    %c0_i32 = arith.constant 0 : i32
    %c0_i32_0 = arith.constant 0 : i32
    %c0_i32_1 = arith.constant 0 : i32
    %c0_i32_2 = arith.constant 0 : i32
    return %c0_i32, %c0_i32_0, %c0_i32_1 : i32, i32, i32
  }
  func.func @transform_5(%arg0: i32) -> (i32, i32, i32) {
    %c0_i32 = arith.constant 0 : i32
    %c0_i32_0 = arith.constant 0 : i32
    %c0_i32_1 = arith.constant 0 : i32
    %c0_i32_2 = arith.constant 0 : i32
    return %c0_i32, %c0_i32_0, %c0_i32_1 : i32, i32, i32
  }
  func.func @transform_6(%arg0: i32) -> (i32, i32) {
    %c0_i32 = arith.constant 0 : i32
    %c0_i32_0 = arith.constant 0 : i32
    %c0_i32_1 = arith.constant 0 : i32
    return %c0_i32, %c0_i32_0 : i32, i32
  }
  func.func @transform_7(%arg0: i32) -> (i32, i32) {
    %c0_i32 = arith.constant 0 : i32
    %c0_i32_0 = arith.constant 0 : i32
    %c0_i32_1 = arith.constant 0 : i32
    return %c0_i32, %c0_i32_0 : i32, i32
  }
  func.func @transform_8(%arg0: i32) -> (i32, i32) {
    %c0_i32 = arith.constant 0 : i32
    %c0_i32_0 = arith.constant 0 : i32
    %c0_i32_1 = arith.constant 0 : i32
    return %c0_i32, %c0_i32_0 : i32, i32
  }
  func.func @transform_9(%arg0: i32) -> (i32, i32) {
    %c0_i32 = arith.constant 0 : i32
    %c0_i32_0 = arith.constant 0 : i32
    %c0_i32_1 = arith.constant 0 : i32
    return %c0_i32, %c0_i32_0 : i32, i32
  }
  func.func @transform_10(%arg0: i32) -> (i32, i32) {
    %c0_i32 = arith.constant 0 : i32
    %c0_i32_0 = arith.constant 0 : i32
    %c0_i32_1 = arith.constant 0 : i32
    return %c0_i32, %c0_i32_0 : i32, i32
  }
  func.func @transform_11(%arg0: i32) -> (i32, i32) {
    %c0_i32 = arith.constant 0 : i32
    %c0_i32_0 = arith.constant 0 : i32
    %c0_i32_1 = arith.constant 0 : i32
    return %c0_i32, %c0_i32_0 : i32, i32
  }
  func.func @transform_12(%arg0: i32) -> (i32, i32) {
    %c0_i32 = arith.constant 0 : i32
    %c0_i32_0 = arith.constant 0 : i32
    %c0_i32_1 = arith.constant 0 : i32
    return %c0_i32, %c0_i32_0 : i32, i32
  }
  func.func @transform_13(%arg0: i32) -> (i32, i32) {
    %c0_i32 = arith.constant 0 : i32
    %c0_i32_0 = arith.constant 0 : i32
    %c0_i32_1 = arith.constant 0 : i32
    return %c0_i32, %c0_i32_0 : i32, i32
  }
  func.func @transform_14(%arg0: i32) -> (i32, i32) {
    %c0_i32 = arith.constant 0 : i32
    %c0_i32_0 = arith.constant 0 : i32
    %c0_i32_1 = arith.constant 0 : i32
    return %c0_i32, %c0_i32_0 : i32, i32
  }
  func.func @transform_15(%arg0: i32) -> (i32, i32) {
    %c0_i32 = arith.constant 0 : i32
    %c0_i32_0 = arith.constant 0 : i32
    %c0_i32_1 = arith.constant 0 : i32
    return %c0_i32, %c0_i32_0 : i32, i32
  }
  func.func @transform_16(%arg0: i32) -> (i32, i32) {
    %c0_i32 = arith.constant 0 : i32
    %c0_i32_0 = arith.constant 0 : i32
    %c0_i32_1 = arith.constant 0 : i32
    return %c0_i32, %c0_i32_0 : i32, i32
  }
  func.func @transform_17(%arg0: i32) -> (i32, i32) {
    %c0_i32 = arith.constant 0 : i32
    %c0_i32_0 = arith.constant 0 : i32
    %c0_i32_1 = arith.constant 0 : i32
    return %c0_i32, %c0_i32_0 : i32, i32
  }
  func.func @transform_18(%arg0: i32) -> (i32, i32) {
    %c0_i32 = arith.constant 0 : i32
    %c0_i32_0 = arith.constant 0 : i32
    %c0_i32_1 = arith.constant 0 : i32
    return %c0_i32, %c0_i32_0 : i32, i32
  }
  func.func @transform_19(%arg0: i32) -> (i32, i32, i32) {
    %c0_i32 = arith.constant 0 : i32
    %c0_i32_0 = arith.constant 0 : i32
    %c0_i32_1 = arith.constant 0 : i32
    return %arg0, %c0_i32, %c0_i32_0 : i32, i32, i32
  }
}

</mosaic_0001>

<bundles_post_ra>
// kernel: tpu_custom_call.1
= control target key start
LH: loop header
LB: loop body
LE: loop exit
PB: predicated region body
PF: predicated region fallthrough
CT: control target
= control target key end

     0   :  { %s4057_s0 = inlined_call_operand.hbm [shape: f32[2,8,8,8], index: 0, kind: input, shape index: {}]   ;;  %s4058_s1 = inlined_call_operand.vmem [shape: f32[2,8,5], index: 1, kind: input, shape index: {}]   ;;  %s4059_s2 = inlined_call_operand.vmem [shape: f32[1,3], index: 2, kind: input, shape index: {}]   ;;  %s4060_s3 = inlined_call_operand.<no memory space> [shape: f32[1,1], index: 3, kind: input, shape index: {}]   ;;  %s4061_s4 = inlined_call_operand.vmem [shape: f32[1,1,128], index: 4, kind: input, shape index: {}]   ;;  %s4062_s5 = inlined_call_operand.vmem [shape: f32[1,1,128], index: 5, kind: input, shape index: {}]   ;;  %s4063_s6 = inlined_call_operand.vmem [shape: f32[32,128], index: 6, kind: input, shape index: {}]   ;;  %s4064_s7 = inlined_call_operand.vmem [shape: f32[32,10], index: 7, kind: input, shape index: {}]   ;;  %s4065_s8 = inlined_call_operand.vmem [shape: f32[1,10], index: 8, kind: input, shape index: {}]   ;;  %s4066_s9 = inlined_call_operand.vmem [shape: f32[10,1], index: 9, kind: input, shape index: {}]   ;;  %s4067_s10 = inlined_call_operand.<no memory space> [shape: f32[1,1], index: 10, kind: input, shape index: {}]   ;;  %s4068_s11 = inlined_call_operand.vmem [shape: f32[5,10], index: 11, kind: input, shape index: {}]   ;;  %s4069_s12 = inlined_call_operand.vmem [shape: f32[1,10], index: 12, kind: input, shape index: {}]   ;;  %s4070_s13 = inlined_call_operand.vmem [shape: f32[10,1], index: 13, kind: input, shape index: {}]   ;;  %s4071_s15 = inlined_call_operand.vmem [shape: f32[2,2], index: 15, kind: input, shape index: {}]   ;;  %s4072_s16 = inlined_call_operand.vmem [shape: f32[1,2], index: 16, kind: input, shape index: {}]   ;;  %s4073_s17 = inlined_call_operand.vmem [shape: f32[2,1], index: 17, kind: input, shape index: {}]   ;;  %s4074_s19 = inlined_call_operand.vmem [shape: f32[2,8,1], index: 19, kind: output, shape index: {}]   ;;  %s4075_s14 = inlined_call_operand.<no memory space> [shape: f32[1,1], index: 14, kind: input, shape index: {}]   ;;  %s4076_s18 = inlined_call_operand.<no memory space> [shape: f32[1,1], index: 18, kind: input, shape index: {}]  }
   0x1   :  { %4083 = sst [smem:[#allocation16_spill]] %s4057_s0  ;;  %v25_v0 = vstv %s4067_s10  ;;  %v27_v1 = vstv %s4075_s14  ;;  %v29_v2 = vstv %s4076_s18 }
   0x2   :  { %4084 = sst [smem:[#allocation17_spill]] %s4058_s1  ;;  %26 = vst [vmem:[#allocation4] sm:$0x1] %v25_v0  ;;  %28 = vst [vmem:[#allocation5] sm:$0x1] %v27_v1 }
   0x3   :  { %4085 = sst [smem:[#allocation18_spill]] %s4059_s2  ;;  %30 = vst [vmem:[#allocation6] sm:$0x1] %v29_v2 }
   0x4   :  { %4086 = sst [smem:[#allocation19_spill]] %s4060_s3 }
   0x5   :  { %4087 = sst [smem:[#allocation20_spill]] %s4072_s16  ;;  %s4088_s20 = sld [smem:[#allocation19_spill]] }
   0xb   :  { %24 = sst [smem:[#allocation3]] %s4088_s20 }
   0xc   :  { %31 = vsyncpa [#allocation8], 0 }
   0xd   :  { %33 = vsyncpa [#allocation8 + $0x1], 0 }
   0xe   :  { %34 = vsyncpa [#allocation9], 0  ;;  %s3424_s25 = smov 0   ;;  %s3426_s3 = smov 0  }
   0xf   :  { %s3428_s26 = smov 0   ;;  %s3430_s10 = smov 0  }
  0x10 LB: > { %4089 = sst [smem:[#allocation13_spill]] %s3279_s26  ;;  %s3443_s14 = sadd.s32 4294967295, %s3283_s10   ;;  %s3283_s10 = sphi %s3430_s10, %s4105_s10   ;;  %s3279_s26 = sphi %s3428_s26, %s4107_s26   ;;  %s3275_s3 = sphi %s3426_s3, %s4109_s3   ;;  %s3271_s25 = sphi %s3424_s25, %s4108_s25  }
  0x11   : > { %s3446_s18 = sadd.s32 1, %s3283_s10   ;;  %s47_s28 = sadd.s32 1, %s3279_s26 }
  0x12   : > { %4090 = sst [smem:[#allocation14_spill]] %s3446_s18  ;;  %s44_s27 = ssub.s32 %s3283_s10, %s3446_s18 }
  0x13   : > { %p45_p0 = scmp.eq.s32.totalorder %s44_s27, 0  ;;  %p54_p1 = scmp.ne.s32.totalorder %s3279_s26, %s3275_s3 }
  0x14   : > { %p55_p2 = scmp.eq.s32.totalorder %s3283_s10, 0  ;;  %p60_p3 = scmp.ne.s32.totalorder %s3275_s3, %s3271_s25 }
  0x15   : > { %s3456_s29 = scalar_select %p45_p0, %s3279_s26, %s47_s28  }
  0x16   : > { %p56_p4 = por %p55_p2, %p54_p1  ;;  %p61_p5 = scmp.eq.s32.totalorder %s3443_s14, 0 }
  0x17   : > { %4091 = sst [smem:[#allocation15_spill]] %s3456_s29  ;;  %p2694_p6 = scmp.ge.s32.totalorder %s3283_s10, 1 }
  0x18   : > { %p480_p7 = scmp.lt.s32.totalorder %s3283_s10, 3  ;;  %p3463_p8 = por %p61_p5, %p60_p3 }
  0x19   : > { %s4094_s1 = sld [smem:[#allocation18_spill]]  ;;  %p3050_p11 = scmp.lt.s32.totalorder %s3283_s10, 2 }
  0x1a   : > { %s4092_s0 = scalar_select %p3463_p8, 1, 0 }
  0x1b   : > { %p3467_p9 = pnand %p2694_p6, %p480_p7  ;;  %s552_s2 = sand.u32 1, %s3279_s26  }
  0x1c   : > { %p3484_p13 = pnand %p3050_p11, %p56_p4  ;;  %s2697_s25 = sshll.u32 %s552_s2, 6 }
  0x1d   : > { %s4093_s30 = scalar_select %p3467_p9, 1, 0 }
  0x1e   : > { %p3041_p10 = pneg %p3467_p9 }
  0x1f   : > { %s493_s22 = sshll.u32 %s4094_s1, 4  ;;  %s494_s22 = int_to_ptr.vmem [resolvable:$true] %s493_s22 }
  0x20   : > { %p3480_p12 = pnand %p3041_p10, %p61_p5  ;;  %s3188_s27 = scalar_lea.vmem %s494_s22, 16 }
  0x21   : > { %p3189_p0 = scmp.ne.s32.totalorder %s494_s22, %s3188_s27  ;;  %p3196_p6 = scmp.lt.s32.totalorder %s494_s22, %s494_s22 }
  0x22   : > { %p3190_p1 = pneg %p3480_p12  ;;  %p3197_p7 = scmp.lt.s32.totalorder %s3188_s27, %s3188_s27 }
  0x24   : > { %p3191_p2 = pnand %p3190_p1, %p3189_p0  ;;  %p3198_p8 = por %p3197_p7, %p3196_p6 }
  0x26   : > { %p3192_p3 = pneg %p3191_p2 }
  0x28   : > { %p3199_p9 = pnand %p3198_p8, %p3192_p3 }
  0x2a   : > { %3202 = shalt.err (!%p3199_p9)
}
  0x2b   : > { %s3297_s28 = smov [#allocation10]   ;;  %s2786_s20 = sshll.u32 %s3283_s10, 10 }
  0x2c   : > { %3044 = dma.vmem_to_smem (!%p3480_p12), %s494_s22, 16, %s3297_s28, [#allocation9]  }
  0x2d   : > { %s4097_s29 = sld [smem:[#allocation16_spill]]  ;;  %s556_s27 = scalar_lea.vmem [#allocation7], %s2697_s25 }
  0x2e   : > { %s563_s18 = sshll.u32 %s556_s27, 4  ;;  %s3500_s16 = scalar_lea.sflag [#allocation8], %s552_s2  ;;  %s3498_s18 = int_to_ptr.vmem [resolvable:$true] %s563_s18 }
  0x2f   : > { %p3205_p8 = pneg %p3484_p13 }
  0x33   : > { %s3496_s26 = scalar_lea.hbm %s4097_s29, %s2786_s20  ;;  %s3208_s28 = scalar_lea.hbm %s4097_s29, 2048 }
  0x34   : > { %s3203_s23 = scalar_lea.hbm %s3496_s26, 1024  ;;  %p3209_p11 = scmp.lt.u32.totalorder %s3496_s26, %s4097_s29 }
  0x35   : > { %p3204_p4 = scmp.ne.s32.totalorder %s3496_s26, %s3203_s23  ;;  %p3210_p12 = scmp.lt.u32.totalorder %s3208_s28, %s3203_s23 }
  0x36   : > { %p3212_p1 = scmp.lt.u32.totalorder %s3203_s23, %s3496_s26 }
  0x37   : > { %p3206_p9 = pnand %p3205_p8, %p3204_p4  ;;  %p3211_p0 = por %p3210_p12, %p3209_p11 }
  0x39   : > { %p3207_p10 = pneg %p3206_p9  ;;  %p3213_p2 = por %p3212_p1, %p3211_p0 }
  0x3b   : > { %p3214_p3 = pnand %p3213_p2, %p3207_p10 }
  0x3d   : > { %3217 = shalt.err (!%p3214_p3)
}
  0x3e   : > { %s3218_s2 = scalar_lea.vmem %s3498_s18, 1024  ;;  %s3298_s25 = smov [#allocation7]  }
  0x3f   : > { %p3219_p6 = scmp.ne.s32.totalorder %s3498_s18, %s3218_s2  ;;  %s3223_s1 = sshll.u32 %s3298_s25, 4  ;;  %s3224_s1 = int_to_ptr.vmem [resolvable:$false] %s3223_s1 }
  0x40   : > { %s3225_s27 = scalar_lea.vmem %s3224_s1, 2048  ;;  %p3226_p9 = scmp.lt.s32.totalorder %s3498_s18, %s3224_s1 }
  0x41   : > { %p3221_p7 = pnand %p3219_p6, %p3205_p8  ;;  %p3227_p11 = scmp.lt.s32.totalorder %s3225_s27, %s3218_s2 }
  0x43   : > { %p3222_p4 = pneg %p3221_p7  ;;  %p3228_p12 = por %p3227_p11, %p3226_p9 }
  0x45   : > { %p3229_p0 = pnand %p3228_p12, %p3222_p4 }
  0x47   : > { %3232 = shalt.err (!%p3229_p0)
}
  0x48   : > { %s3299_s23 = smov 128   ;;  %s3300_s10 = smov 8  }
  0x49   : > { %3048 = dma.hbm_to_vmem [thread:$0]  (!%p3484_p13), %s3496_s26, 1024, %s3498_s18, %s3500_s16, %s3299_s23, %s3299_s23, %s3300_s10  }
  0x4a   : > { %p4098_p8 = scmp.ne.s32.totalorder %s4093_s30, 0 }
  0x4b   : > { %s584_s22 = sand.u32 (!%p4098_p8), 1, %s3275_s3   ;;  %p4099_p10 = scmp.ne.s32.totalorder (!%p4098_p8), %s4092_s0, 0 }
  0x4c   : > { %582 = sbr.rel (%p4098_p8) target bundleno = 7047 (0x1b87), region = 96  ;;  %s2701_s28 = sshll.u32 (!%p4098_p8), %s584_s22, 6 }
  0x4d   : > { %s585_s20 = scalar_lea.sflag (!%p4098_p8), [#allocation8], %s584_s22  ;;  %s3531_s21 = scalar_lea.vmem (!%p4098_p8), [#allocation7], %s2701_s28 }
  0x53   : > { %3262 = dma.done.wait (%p4099_p10), %s585_s20, 1024  }
  0x54   : > { %3264 = vsyncadd (%p4099_p10), %s585_s20, 4294966272 }
  0x55   : > { %3266 = dma.done.wait (%p61_p5), [#allocation9], 16  }
  0x56   : > { %3268 = vsyncadd (%p61_p5), [#allocation9], 4294967280 }
  0x57   : > { %597 = sfence }
  0x58   : > { %s662_s16 = sld [smem:[#allocation10]]  ;;  %s2705_s26 = sld [smem:[#allocation10 + $0x1]]  ;;  %v665_v3 = vld [vmem:[%s3531_s21] sm:$0x3f]  ;;  %v2709_v4 = vld [vmem:[%s3531_s21 + $0x8] sm:$0x3f]  ;;  %v680_v9 = vlaneseq }
  0x59   : > { %s2706_s18 = sld [smem:[#allocation10 + $0x2]]  ;;  %s661_s30 = sld [smem:[#allocation3]]  ;;  %v669_v5 = vld [vmem:[%s3531_s21 + $0x1] sm:$0x3f]  ;;  %v2710_v7 = vld [vmem:[%s3531_s21 + $0x9] sm:$0x3f] }
  0x5a   : > { %v673_v6 = vld [vmem:[%s3531_s21 + $0x2] sm:$0x3f]  ;;  %v2711_v17 = vld [vmem:[%s3531_s21 + $0xa] sm:$0x3f]  ;;  %v681_v19 = vshrl.u32 %v680_v9, 7  ;;  %p651_p5 = scmp.lt.s32.totalorder %s3443_s14, 1 }
  0x5b   : > { %v2724_v23 = vld [vmem:[%s3531_s21 + $0x30] sm:$0x3f]  ;;  %v2727_v50 = vld [vmem:[%s3531_s21 + $0x38] sm:$0x3f]  ;;  %s4100_s25 = sld [smem:[#allocation17_spill]] }
  0x5c   : > { %v2725_v25 = vld [vmem:[%s3531_s21 + $0x31] sm:$0x3f]  ;;  %v3564_v27 = vsub.s32 2, %v681_v19  ;;  %v3566_v28 = vsub.s32 0, %v681_v19  ;;  %v3571_v34 = vsub.s32 3, %v681_v19  ;;  %v3573_v35 = vsub.s32 1, %v681_v19 }
  0x5d   : > { %v2712_v31 = vld [vmem:[%s3531_s21 + $0x10] sm:$0x3f]  ;;  %v3579_v41 = vsub.s32 5, %v681_v19  ;;  %v3586_v47 = vsub.s32 4, %v681_v19  ;;  %v2728_v51 = vld [vmem:[%s3531_s21 + $0x39] sm:$0x3f] }
  0x5e   : > { %v3546_v8 = vstv %s662_s16  ;;  %v3549_v11 = vstv %s2705_s26  ;;  %v2713_v36 = vld [vmem:[%s3531_s21 + $0x11] sm:$0x3f]  ;;  %v2729_v54 = vld [vmem:[%s3531_s21 + $0x3a] sm:$0x3f]  ;;  %s4111_s14 = smov (!%p651_p5, %s3443_s14), 1 }
  0x5f   : > { %v667_v10 = vmul.f32 %v3546_v8, %v665_v3  ;;  %v3551_v12 = vstv %s2706_s18  ;;  %v754_v13 = vmul.f32 %v2709_v4, %v3546_v8  ;;  %v671_v14 = vmul.f32 %v3549_v11, %v669_v5  ;;  %v2726_v38 = vld [vmem:[%s3531_s21 + $0x32] sm:$0x3f]  ;;  %v2715_v63 = vld [vmem:[%s3531_s21 + $0x18] sm:$0x3f]  ;;  %s2703_s0 = sshll.u32 %s4111_s14, 3 }
  0x60   : > { %v675_v15 = vmul.f32 %v3551_v12, %v673_v6  ;;  %v757_v16 = vmul.f32 %v2710_v7, %v3549_v11  ;;  %v3558_v20 = vstv %s661_s30  ;;  %v760_v22 = vmul.f32 %v2711_v17, %v3551_v12  ;;  %v2714_v48 = vld [vmem:[%s3531_s21 + $0x12] sm:$0x3f]  ;;  %v2716_v3 = vld [vmem:[%s3531_s21 + $0x19] sm:$0x3f]  ;;  %s3709_s10 = scalar_lea.vmem %s4074_s19, %s2703_s0 }
  0x61   : > { %v672_v18 = vadd.f32 %v671_v14, %v667_v10  ;;  %v1119_v29 = vmul.f32 %v2724_v23, %v3546_v8  ;;  %v1122_v32 = vmul.f32 %v2725_v25, %v3549_v11  ;;  %v827_v43 = vmul.f32 %v2712_v31, %v3546_v8  ;;  %s3704_s1 = scalar_lea.vmem %s4100_s25, %s2703_s0  ;;  %s3859_s25 = smov 0  }
  0x62   : > { %v758_v21 = vadd.f32 %v757_v16, %v754_v13  ;;  %v830_v44 = vmul.f32 %v2713_v36, %v3549_v11  ;;  %v1125_v49 = vmul.f32 %v2726_v38, %v3551_v12  ;;  %v833_v53 = vmul.f32 %v2714_v48, %v3551_v12 }
  0x63   : > { %v676_v24 = vadd.f32 %v675_v15, %v672_v18  ;;  %v1123_v37 = vadd.f32 %v1122_v32, %v1119_v29  ;;  %v1192_v59 = vmul.f32 %v2727_v50, %v3546_v8  ;;  %v1195_v60 = vmul.f32 %v2728_v51, %v3549_v11  ;;  %v2717_v15 = vld [vmem:[%s3531_s21 + $0x1a] sm:$0x3f] }
  0x64   : > { %v761_v30 = vadd.f32 %v760_v22, %v758_v21  ;;  %v831_v52 = vadd.f32 %v830_v44, %v827_v43  ;;  %v1198_v61 = vmul.f32 %v2729_v54, %v3551_v12  ;;  %v900_v5 = vmul.f32 %v2715_v63, %v3546_v8  ;;  %v2718_v44 = vld [vmem:[%s3531_s21 + $0x20] sm:$0x3f] }
  0x65   : > { %v678_v26 = vadd.f32 %v3558_v20, %v676_v24  ;;  %v1126_v58 = vadd.f32 %v1125_v49, %v1123_v37  ;;  %v1196_v4 = vadd.f32 %v1195_v60, %v1192_v59  ;;  %v903_v14 = vmul.f32 %v2716_v3, %v3549_v11 }
  0x66   : > { %v762_v42 = vadd.f32 %v761_v30, %v3558_v20  ;;  %v834_v62 = vadd.f32 %v833_v53, %v831_v52  ;;  %v906_v24 = vmul.f32 %v2717_v15, %v3551_v12  ;;  %v2720_v52 = vld [vmem:[%s3531_s21 + $0x22] sm:$0x3f] }
  0x67   : > { %v679_v33 = vmax.f32 %v678_v26, 0.0  ;;  %v1127_v0 = vadd.f32 %v1126_v58, %v3558_v20  ;;  %v1199_v7 = vadd.f32 %v1198_v61, %v1196_v4  ;;  %v904_v31 = vadd.f32 %v903_v14, %v900_v5  ;;  %v2721_v61 = vld [vmem:[%s3531_s21 + $0x28] sm:$0x3f] }
  0x68   : > { %v763_v57 = vmax.f32 %v762_v42, 0.0  ;;  %v835_v13 = vadd.f32 %v834_v62, %v3558_v20  ;;  %v979_v53 = vmul.f32 %v2720_v52, %v3551_v12  ;;  %v2722_v62 = vld [vmem:[%s3531_s21 + $0x29] sm:$0x3f]  ;;  %v1046_v63 = vmul.f32 %v2721_v61, %v3546_v8 }
  0x69   : > { %v697_v39 = vrot.slane %v679_v33, %v3564_v27  ;;  %v683_v40 = vrot.slane %v679_v33, %v3566_v28  ;;  %v704_v45 = vrot.slane %v679_v33, %v3571_v34  ;;  %v690_v46 = vrot.slane %v679_v33, %v3573_v35  ;;  %v2723_v4 = vld [vmem:[%s3531_s21 + $0x2a] sm:$0x3f] }
  0x6a   : > { %v718_v55 = vrot.slane %v679_v33, %v3579_v41  ;;  %v711_v56 = vrot.slane %v679_v33, %v3586_v47  ;;  %v774_v1 = vrot.slane %v763_v57, %v3573_v35  ;;  %v767_v2 = vrot.slane %v763_v57, %v3566_v28 }
  0x6b   : > { %699 = vbcast.lane.b32.xlu1 %v697_v39, 256  ;;  %685 = vbcast.lane.b32.xlu0 %v683_v40, 256  ;;  %v3605_v6 = vmax.f32 %v1127_v0, 0.0  ;;  %v788_v9 = vrot.slane %v763_v57, %v3571_v34  ;;  %v781_v10 = vrot.slane %v763_v57, %v3564_v27  ;;  %v1200_v23 = vadd.f32 %v1199_v7, %v3558_v20 }
  0x6c   : > { %v802_v26 = vrot.slane %v763_v57, %v3579_v41  ;;  %v795_v29 = vrot.slane %v763_v57, %v3586_v47  ;;  %v836_v30 = vmax.f32 %v835_v13, 0.0  ;;  %v907_v43 = vadd.f32 %v906_v24, %v904_v31 }
  0x6d   : > { %v1139_v16 = vrot.slane %v3605_v6, %v3573_v35  ;;  %v1132_v17 = vrot.slane %v3605_v6, %v3566_v28  ;;  %v1153_v18 = vrot.slane %v3605_v6, %v3571_v34  ;;  %v1146_v19 = vrot.slane %v3605_v6, %v3564_v27 }
  0x6e   : > { %v1167_v21 = vrot.slane %v3605_v6, %v3579_v41  ;;  %v1160_v22 = vrot.slane %v3605_v6, %v3586_v47  ;;  %v3626_v25 = vmax.f32 %v1200_v23, 0.0  ;;  %v847_v40 = vrot.slane %v836_v30, %v3573_v35  ;;  %v3719_v6 = vld [vmem:[%s4063_s6 + $0x8] sm:$0xff] }
  0x6f   : > { %706 = vbcast.lane.b32.xlu1 %v704_v45, 256  ;;  %692 = vbcast.lane.b32.xlu0 %v690_v46, 256  ;;  %v840_v42 = vrot.slane %v836_v30, %v3566_v28  ;;  %v2719_v45 = vld [vmem:[%s3531_s21 + $0x21] sm:$0x3f]  ;;  %v973_v46 = vmul.f32 %v2718_v44, %v3546_v8  ;;  %v861_v49 = vrot.slane %v836_v30, %v3571_v34 }
  0x70   : > { %v1212_v32 = vrot.slane %v3626_v25, %v3573_v35  ;;  %v1205_v33 = vrot.slane %v3626_v25, %v3566_v28  ;;  %v1226_v36 = vrot.slane %v3626_v25, %v3571_v34  ;;  %v1219_v37 = vrot.slane %v3626_v25, %v3564_v27 }
  0x71   : > { %v1240_v38 = vrot.slane %v3626_v25, %v3579_v41  ;;  %v1233_v39 = vrot.slane %v3626_v25, %v3586_v47  ;;  %v976_v48 = vmul.f32 %v2719_v45, %v3549_v11  ;;  %v854_v50 = vrot.slane %v836_v30, %v3564_v27 }
  0x72   : > { %v908_v51 = vadd.f32 %v907_v43, %v3558_v20  ;;  %v875_v54 = vrot.slane %v836_v30, %v3579_v41  ;;  %v1049_v0 = vmul.f32 %v2722_v62, %v3549_v11  ;;  %v1052_v5 = vmul.f32 %v2723_v4, %v3551_v12 }
  0x73   : > { %720 = vbcast.lane.b32.xlu1 %v718_v55, 256  ;;  %713 = vbcast.lane.b32.xlu0 %v711_v56, 256  ;;  %v868_v55 = vrot.slane %v836_v30, %v3586_v47  ;;  %v977_v57 = vadd.f32 %v976_v48, %v973_v46 }
  0x74   : > { %v909_v56 = vmax.f32 %v908_v51, 0.0 }
  0x75   : > { %v980_v60 = vadd.f32 %v979_v53, %v977_v57 }
  0x76   : > { %v920_v58 = vrot.slane %v909_v56, %v3573_v35  ;;  %v913_v59 = vrot.slane %v909_v56, %v3566_v28  ;;  %v948_v7 = vrot.slane %v909_v56, %v3579_v41 }
  0x77   : > { %776 = vbcast.lane.b32.xlu1 %v774_v1, 256  ;;  %769 = vbcast.lane.b32.xlu0 %v767_v2, 256  ;;  %v934_v1 = vrot.slane %v909_v56, %v3571_v34  ;;  %v927_v2 = vrot.slane %v909_v56, %v3564_v27  ;;  %v981_v3 = vadd.f32 %v980_v60, %v3558_v20 }
  0x79   : > { %v982_v8 = vmax.f32 %v981_v3, 0.0 }
  0x7b   : > { %790 = vbcast.lane.b32.xlu1 %v788_v9, 256  ;;  %783 = vbcast.lane.b32.xlu0 %v781_v10, 256  ;;  %v941_v9 = vrot.slane %v909_v56, %v3586_v47  ;;  %v1050_v10 = vadd.f32 %v1049_v0, %v1046_v63  ;;  %v993_v11 = vrot.slane %v982_v8, %v3573_v35 }
  0x7c   : > { %v986_v13 = vrot.slane %v982_v8, %v3566_v28  ;;  %v1007_v15 = vrot.slane %v982_v8, %v3571_v34  ;;  %v1000_v12 = vrot.slane %v982_v8, %v3564_v27  ;;  %v1021_v24 = vrot.slane %v982_v8, %v3579_v41 }
  0x7d   : > { %v1053_v14 = vadd.f32 %v1052_v5, %v1050_v10 }
  0x7f   : > { %804 = vbcast.lane.b32.xlu1 %v802_v26, 256  ;;  %797 = vbcast.lane.b32.xlu0 %v795_v29, 256  ;;  %v1054_v23 = vadd.f32 %v1053_v14, %v3558_v20  ;;  %v1014_v26 = vrot.slane %v982_v8, %v3586_v47 }
  0x81   : > { %v1055_v29 = vmax.f32 %v1054_v23, 0.0 }
  0x83   : > { %849 = vbcast.lane.b32.xlu1 %v847_v40, 256  ;;  %842 = vbcast.lane.b32.xlu0 %v840_v42, 256  ;;  %v1066_v30 = vrot.slane %v1055_v29, %v3573_v35  ;;  %v1059_v31 = vrot.slane %v1055_v29, %v3566_v28  ;;  %v1080_v40 = vrot.slane %v1055_v29, %v3571_v34  ;;  %v3757_v34 = vld [vmem:[%s4062_s5] ss:$0 sm:$0xff] }
  0x84   : > { %v1073_v20 = vrot.slane %v1055_v29, %v3564_v27  ;;  %v1094_v42 = vrot.slane %v1055_v29, %v3579_v41  ;;  %v1087_v43 = vrot.slane %v1055_v29, %v3586_v47 }
  0x87   : > { %863 = vbcast.lane.b32.xlu1 %v861_v49, 256  ;;  %856 = vbcast.lane.b32.xlu0 %v854_v50, 256 }
  0x8b   : > { %877 = vbcast.lane.b32.xlu1 %v875_v54, 256  ;;  %870 = vbcast.lane.b32.xlu0 %v868_v55, 256 }
  0x8f   : > { %922 = vbcast.lane.b32.xlu1 %v920_v58, 256  ;;  %915 = vbcast.lane.b32.xlu0 %v913_v59, 256 }
  0x93   : > { %936 = vbcast.lane.b32.xlu1 %v934_v1, 256  ;;  %929 = vbcast.lane.b32.xlu0 %v927_v2, 256 }
  0x97   : > { %950 = vbcast.lane.b32.xlu1 %v948_v7, 256  ;;  %943 = vbcast.lane.b32.xlu0 %v941_v9, 256 }
  0x9b   : > { %995 = vbcast.lane.b32.xlu1 %v993_v11, 256  ;;  %988 = vbcast.lane.b32.xlu0 %v986_v13, 256 }
  0x9f   : > { %1009 = vbcast.lane.b32.xlu1 %v1007_v15, 256  ;;  %1002 = vbcast.lane.b32.xlu0 %v1000_v12, 256 }
  0xa3   : > { %1023 = vbcast.lane.b32.xlu1 %v1021_v24, 256  ;;  %1016 = vbcast.lane.b32.xlu0 %v1014_v26, 256 }
  0xa7   : > { %1068 = vbcast.lane.b32.xlu1 %v1066_v30, 256  ;;  %1061 = vbcast.lane.b32.xlu0 %v1059_v31, 256 }
  0xab   : > { %1082 = vbcast.lane.b32.xlu1 %v1080_v40, 256  ;;  %1075 = vbcast.lane.b32.xlu0 %v1073_v20, 256 }
  0xaf   : > { %1096 = vbcast.lane.b32.xlu1 %v1094_v42, 256  ;;  %1089 = vbcast.lane.b32.xlu0 %v1087_v43, 256 }
  0xb3   : > { %1141 = vbcast.lane.b32.xlu1 %v1139_v16, 256  ;;  %1134 = vbcast.lane.b32.xlu0 %v1132_v17, 256  ;;  %v3714_v16 = vld [vmem:[%s4063_s6] sm:$0xff]  ;;  %v3724_v17 = vld [vmem:[%s4063_s6 + $0x10] sm:$0xff] }
  0xb7   : > { %1155 = vbcast.lane.b32.xlu1 %v1153_v18, 256  ;;  %1148 = vbcast.lane.b32.xlu0 %v1146_v19, 256  ;;  %v3735_v18 = vld [vmem:[%s4063_s6 + $0x18] sm:$0xff]  ;;  %v3752_v19 = vld [vmem:[%s4061_s4] ss:$0 sm:$0xff] }
  0xbb   : > { %1169 = vbcast.lane.b32.xlu1 %v1167_v21, 256  ;;  %1162 = vbcast.lane.b32.xlu0 %v1160_v22, 256 }
  0xbf   : > { %1214 = vbcast.lane.b32.xlu1 %v1212_v32, 256  ;;  %1207 = vbcast.lane.b32.xlu0 %v1205_v33, 256 }
  0xc3   : > { %1228 = vbcast.lane.b32.xlu1 %v1226_v36, 256  ;;  %1221 = vbcast.lane.b32.xlu0 %v1219_v37, 256 }
  0xc7   : > { %1242 = vbcast.lane.b32.xlu1 %v1240_v38, 256  ;;  %1235 = vbcast.lane.b32.xlu0 %v1233_v39, 256 }
  0xdd   : > { %v700_v21 = vpop.permute.xlu1 %699  ;;  %v686_v27 = vpop.permute.xlu0 %685 }
  0xde   : > { %v730_v22 = vmul.f32 %v3752_v19, %v700_v21  ;;  %v728_v41 = vmul.f32 %v3752_v19, %v686_v27 }
  0xe0   : > { %v742_v32 = vadd.f32 %v3757_v34, %v730_v22  ;;  %v740_v47 = vadd.f32 %v3757_v34, %v728_v41 }
  0xe1   : > { %v707_v25 = vpop.permute.xlu1 %706  ;;  %v693_v33 = vpop.permute.xlu0 %692 }
  0xe2   : > { %748 = vst [vmem:[#allocation2 + $0x10] sm:$0xff] %v742_v32  ;;  %746 = vst [vmem:[#allocation2] sm:$0xff] %v740_v47  ;;  %v731_v36 = vmul.f32 %v3752_v19, %v707_v25  ;;  %v729_v37 = vmul.f32 %v3752_v19, %v693_v33 }
  0xe4   : > { %v743_v38 = vadd.f32 %v3757_v34, %v731_v36  ;;  %v741_v39 = vadd.f32 %v3757_v34, %v729_v37 }
  0xe5   : > { %v721_v44 = vpop.permute.xlu1 %720  ;;  %v714_v45 = vpop.permute.xlu0 %713 }
  0xe6   : > { %749 = vst [vmem:[#allocation2 + $0x18] sm:$0xff] %v743_v38  ;;  %747 = vst [vmem:[#allocation2 + $0x8] sm:$0xff] %v741_v39  ;;  %v733_v46 = vmul.f32 %v3752_v19, %v721_v44  ;;  %v732_v48 = vmul.f32 %v3752_v19, %v714_v45 }
  0xe8   : > { %v745_v49 = vadd.f32 %v3757_v34, %v733_v46  ;;  %v744_v50 = vadd.f32 %v3757_v34, %v732_v48 }
  0xe9   : > { %v777_v51 = vpop.permute.xlu1 %776  ;;  %v770_v52 = vpop.permute.xlu0 %769 }
  0xea   : > { %751 = vst [vmem:[#allocation2 + $0x28] sm:$0xff] %v745_v49  ;;  %750 = vst [vmem:[#allocation2 + $0x20] sm:$0xff] %v744_v50  ;;  %v807_v53 = vmul.f32 %v3752_v19, %v777_v51  ;;  %v806_v54 = vmul.f32 %v3752_v19, %v770_v52 }
  0xec   : > { %v813_v55 = vadd.f32 %v3757_v34, %v807_v53  ;;  %v812_v56 = vadd.f32 %v3757_v34, %v806_v54 }
  0xed   : > { %v791_v57 = vpop.permute.xlu1 %790  ;;  %v784_v58 = vpop.permute.xlu0 %783 }
  0xee   : > { %820 = vst [vmem:[#allocation2 + $0x38] sm:$0xff] %v813_v55  ;;  %819 = vst [vmem:[#allocation2 + $0x30] sm:$0xff] %v812_v56  ;;  %v809_v59 = vmul.f32 %v3752_v19, %v791_v57  ;;  %v808_v60 = vmul.f32 %v3752_v19, %v784_v58 }
  0xf0   : > { %v815_v61 = vadd.f32 %v3757_v34, %v809_v59  ;;  %v814_v62 = vadd.f32 %v3757_v34, %v808_v60 }
  0xf1   : > { %v805_v63 = vpop.permute.xlu1 %804  ;;  %v798_v0 = vpop.permute.xlu0 %797 }
  0xf2   : > { %822 = vst [vmem:[#allocation2 + $0x48] sm:$0xff] %v815_v61  ;;  %821 = vst [vmem:[#allocation2 + $0x40] sm:$0xff] %v814_v62  ;;  %v811_v1 = vmul.f32 %v3752_v19, %v805_v63  ;;  %v810_v2 = vmul.f32 %v3752_v19, %v798_v0 }
  0xf4   : > { %v817_v3 = vadd.f32 %v3757_v34, %v811_v1  ;;  %v816_v4 = vadd.f32 %v3757_v34, %v810_v2 }
  0xf5   : > { %v850_v5 = vpop.permute.xlu1 %849  ;;  %v843_v7 = vpop.permute.xlu0 %842 }
  0xf6   : > { %824 = vst [vmem:[#allocation2 + $0x58] sm:$0xff] %v817_v3  ;;  %823 = vst [vmem:[#allocation2 + $0x50] sm:$0xff] %v816_v4  ;;  %v880_v9 = vmul.f32 %v3752_v19, %v850_v5  ;;  %v879_v8 = vmul.f32 %v3752_v19, %v843_v7 }
  0xf8   : > { %v886_v10 = vadd.f32 %v3757_v34, %v880_v9  ;;  %v885_v11 = vadd.f32 %v3757_v34, %v879_v8 }
  0xf9   : > { %v864_v13 = vpop.permute.xlu1 %863  ;;  %v857_v14 = vpop.permute.xlu0 %856 }
  0xfa   : > { %893 = vst [vmem:[#allocation2 + $0x68] sm:$0xff] %v886_v10  ;;  %892 = vst [vmem:[#allocation2 + $0x60] sm:$0xff] %v885_v11  ;;  %v882_v15 = vmul.f32 %v3752_v19, %v864_v13  ;;  %v881_v12 = vmul.f32 %v3752_v19, %v857_v14 }
  0xfc   : > { %v888_v23 = vadd.f32 %v3757_v34, %v882_v15  ;;  %v887_v24 = vadd.f32 %v3757_v34, %v881_v12 }
  0xfd   : > { %v878_v26 = vpop.permute.xlu1 %877  ;;  %v871_v29 = vpop.permute.xlu0 %870 }
  0xfe   : > { %895 = vst [vmem:[#allocation2 + $0x78] sm:$0xff] %v888_v23  ;;  %894 = vst [vmem:[#allocation2 + $0x70] sm:$0xff] %v887_v24  ;;  %v884_v30 = vmul.f32 %v3752_v19, %v878_v26  ;;  %v883_v31 = vmul.f32 %v3752_v19, %v871_v29 }
 0x100   : > { %v890_v40 = vadd.f32 %v3757_v34, %v884_v30  ;;  %v889_v20 = vadd.f32 %v3757_v34, %v883_v31 }
 0x101   : > { %v923_v42 = vpop.permute.xlu1 %922  ;;  %v916_v43 = vpop.permute.xlu0 %915 }
 0x102   : > { %897 = vst [vmem:[#allocation2 + $0x88] sm:$0xff] %v890_v40  ;;  %896 = vst [vmem:[#allocation2 + $0x80] sm:$0xff] %v889_v20  ;;  %v953_v21 = vmul.f32 %v3752_v19, %v923_v42  ;;  %v952_v27 = vmul.f32 %v3752_v19, %v916_v43 }
 0x104   : > { %v959_v22 = vadd.f32 %v3757_v34, %v953_v21  ;;  %v958_v41 = vadd.f32 %v3757_v34, %v952_v27 }
 0x105   : > { %v937_v32 = vpop.permute.xlu1 %936  ;;  %v930_v47 = vpop.permute.xlu0 %929 }
 0x106   : > { %966 = vst [vmem:[#allocation2 + $0x98] sm:$0xff] %v959_v22  ;;  %965 = vst [vmem:[#allocation2 + $0x90] sm:$0xff] %v958_v41  ;;  %v955_v25 = vmul.f32 %v3752_v19, %v937_v32  ;;  %v954_v33 = vmul.f32 %v3752_v19, %v930_v47 }
 0x108   : > { %v961_v36 = vadd.f32 %v3757_v34, %v955_v25  ;;  %v960_v37 = vadd.f32 %v3757_v34, %v954_v33 }
 0x109   : > { %v951_v38 = vpop.permute.xlu1 %950  ;;  %v944_v39 = vpop.permute.xlu0 %943 }
 0x10a   : > { %968 = vst [vmem:[#allocation2 + $0xa8] sm:$0xff] %v961_v36  ;;  %967 = vst [vmem:[#allocation2 + $0xa0] sm:$0xff] %v960_v37  ;;  %v957_v44 = vmul.f32 %v3752_v19, %v951_v38  ;;  %v956_v45 = vmul.f32 %v3752_v19, %v944_v39 }
 0x10c   : > { %v963_v46 = vadd.f32 %v3757_v34, %v957_v44  ;;  %v962_v48 = vadd.f32 %v3757_v34, %v956_v45 }
 0x10d   : > { %v996_v49 = vpop.permute.xlu1 %995  ;;  %v989_v50 = vpop.permute.xlu0 %988 }
 0x10e   : > { %970 = vst [vmem:[#allocation2 + $0xb8] sm:$0xff] %v963_v46  ;;  %969 = vst [vmem:[#allocation2 + $0xb0] sm:$0xff] %v962_v48  ;;  %v1026_v51 = vmul.f32 %v3752_v19, %v996_v49  ;;  %v1025_v52 = vmul.f32 %v3752_v19, %v989_v50 }
 0x110   : > { %v1032_v53 = vadd.f32 %v3757_v34, %v1026_v51  ;;  %v1031_v54 = vadd.f32 %v3757_v34, %v1025_v52 }
 0x111   : > { %v1010_v55 = vpop.permute.xlu1 %1009  ;;  %v1003_v56 = vpop.permute.xlu0 %1002 }
 0x112   : > { %1039 = vst [vmem:[#allocation2 + $0xc8] sm:$0xff] %v1032_v53  ;;  %1038 = vst [vmem:[#allocation2 + $0xc0] sm:$0xff] %v1031_v54  ;;  %v1028_v57 = vmul.f32 %v3752_v19, %v1010_v55  ;;  %v1027_v58 = vmul.f32 %v3752_v19, %v1003_v56 }
 0x114   : > { %v1034_v59 = vadd.f32 %v3757_v34, %v1028_v57  ;;  %v1033_v60 = vadd.f32 %v3757_v34, %v1027_v58 }
 0x115   : > { %v1024_v61 = vpop.permute.xlu1 %1023  ;;  %v1017_v62 = vpop.permute.xlu0 %1016 }
 0x116   : > { %1041 = vst [vmem:[#allocation2 + $0xd8] sm:$0xff] %v1034_v59  ;;  %1040 = vst [vmem:[#allocation2 + $0xd0] sm:$0xff] %v1033_v60  ;;  %v1030_v63 = vmul.f32 %v3752_v19, %v1024_v61  ;;  %v1029_v0 = vmul.f32 %v3752_v19, %v1017_v62 }
 0x118   : > { %v1036_v1 = vadd.f32 %v3757_v34, %v1030_v63  ;;  %v1035_v2 = vadd.f32 %v3757_v34, %v1029_v0 }
 0x119   : > { %v1069_v3 = vpop.permute.xlu1 %1068  ;;  %v1062_v4 = vpop.permute.xlu0 %1061 }
 0x11a   : > { %1043 = vst [vmem:[#allocation2 + $0xe8] sm:$0xff] %v1036_v1  ;;  %1042 = vst [vmem:[#allocation2 + $0xe0] sm:$0xff] %v1035_v2  ;;  %v1099_v5 = vmul.f32 %v3752_v19, %v1069_v3  ;;  %v1098_v7 = vmul.f32 %v3752_v19, %v1062_v4  ;;  %v3855_v1 = vmov 0.0   ;;  %v3857_v2 = vmov 0.0  }
 0x11c   : > { %v1105_v9 = vadd.f32 %v3757_v34, %v1099_v5  ;;  %v1104_v8 = vadd.f32 %v3757_v34, %v1098_v7 }
 0x11d   : > { %v1083_v10 = vpop.permute.xlu1 %1082  ;;  %v1076_v11 = vpop.permute.xlu0 %1075 }
 0x11e   : > { %1112 = vst [vmem:[#allocation2 + $0xf8] sm:$0xff] %v1105_v9  ;;  %1111 = vst [vmem:[#allocation2 + $0xf0] sm:$0xff] %v1104_v8  ;;  %v1101_v13 = vmul.f32 %v3752_v19, %v1083_v10  ;;  %v1100_v14 = vmul.f32 %v3752_v19, %v1076_v11 }
 0x120   : > { %v1107_v15 = vadd.f32 %v3757_v34, %v1101_v13  ;;  %v1106_v12 = vadd.f32 %v3757_v34, %v1100_v14 }
 0x121   : > { %v1097_v23 = vpop.permute.xlu1 %1096  ;;  %v1090_v24 = vpop.permute.xlu0 %1089 }
 0x122   : > { %1114 = vst [vmem:[#allocation2 + $0x108] sm:$0xff] %v1107_v15  ;;  %1113 = vst [vmem:[#allocation2 + $0x100] sm:$0xff] %v1106_v12  ;;  %v1103_v26 = vmul.f32 %v3752_v19, %v1097_v23  ;;  %v1102_v29 = vmul.f32 %v3752_v19, %v1090_v24 }
 0x124   : > { %v1109_v30 = vadd.f32 %v3757_v34, %v1103_v26  ;;  %v1108_v31 = vadd.f32 %v3757_v34, %v1102_v29 }
 0x125   : > { %v1142_v40 = vpop.permute.xlu1 %1141  ;;  %v1135_v20 = vpop.permute.xlu0 %1134 }
 0x126   : > { %1116 = vst [vmem:[#allocation2 + $0x118] sm:$0xff] %v1109_v30  ;;  %1115 = vst [vmem:[#allocation2 + $0x110] sm:$0xff] %v1108_v31  ;;  %v1172_v42 = vmul.f32 %v3752_v19, %v1142_v40  ;;  %v1171_v43 = vmul.f32 %v3752_v19, %v1135_v20 }
 0x128   : > { %v1178_v21 = vadd.f32 %v3757_v34, %v1172_v42  ;;  %v1177_v27 = vadd.f32 %v3757_v34, %v1171_v43 }
 0x129   : > { %v1156_v22 = vpop.permute.xlu1 %1155  ;;  %v1149_v41 = vpop.permute.xlu0 %1148 }
 0x12a   : > { %1185 = vst [vmem:[#allocation2 + $0x128] sm:$0xff] %v1178_v21  ;;  %1184 = vst [vmem:[#allocation2 + $0x120] sm:$0xff] %v1177_v27  ;;  %v1174_v32 = vmul.f32 %v3752_v19, %v1156_v22  ;;  %v1173_v47 = vmul.f32 %v3752_v19, %v1149_v41 }
 0x12c   : > { %v1180_v25 = vadd.f32 %v3757_v34, %v1174_v32  ;;  %v1179_v33 = vadd.f32 %v3757_v34, %v1173_v47 }
 0x12d   : > { %v1170_v36 = vpop.permute.xlu1 %1169  ;;  %v1163_v37 = vpop.permute.xlu0 %1162 }
 0x12e   : > { %1187 = vst [vmem:[#allocation2 + $0x138] sm:$0xff] %v1180_v25  ;;  %1186 = vst [vmem:[#allocation2 + $0x130] sm:$0xff] %v1179_v33  ;;  %v1176_v38 = vmul.f32 %v3752_v19, %v1170_v36  ;;  %v1175_v39 = vmul.f32 %v3752_v19, %v1163_v37 }
 0x130   : > { %v1182_v44 = vadd.f32 %v3757_v34, %v1176_v38  ;;  %v1181_v45 = vadd.f32 %v3757_v34, %v1175_v39 }
 0x131   : > { %v1215_v46 = vpop.permute.xlu1 %1214  ;;  %v1208_v48 = vpop.permute.xlu0 %1207 }
 0x132   : > { %1189 = vst [vmem:[#allocation2 + $0x148] sm:$0xff] %v1182_v44  ;;  %1188 = vst [vmem:[#allocation2 + $0x140] sm:$0xff] %v1181_v45  ;;  %v1245_v49 = vmul.f32 %v3752_v19, %v1215_v46  ;;  %v1244_v50 = vmul.f32 %v3752_v19, %v1208_v48 }
 0x134   : > { %v1251_v51 = vadd.f32 %v3757_v34, %v1245_v49  ;;  %v1250_v52 = vadd.f32 %v3757_v34, %v1244_v50 }
 0x135   : > { %v1229_v53 = vpop.permute.xlu1 %1228  ;;  %v1222_v54 = vpop.permute.xlu0 %1221 }
 0x136   : > { %1258 = vst [vmem:[#allocation2 + $0x158] sm:$0xff] %v1251_v51  ;;  %1257 = vst [vmem:[#allocation2 + $0x150] sm:$0xff] %v1250_v52  ;;  %v1247_v55 = vmul.f32 %v3752_v19, %v1229_v53  ;;  %v1246_v56 = vmul.f32 %v3752_v19, %v1222_v54 }
 0x138   : > { %v1253_v57 = vadd.f32 %v3757_v34, %v1247_v55  ;;  %v1252_v58 = vadd.f32 %v3757_v34, %v1246_v56 }
 0x139   : > { %v1243_v59 = vpop.permute.xlu1 %1242  ;;  %v1236_v60 = vpop.permute.xlu0 %1235 }
 0x13a   : > { %1260 = vst [vmem:[#allocation2 + $0x168] sm:$0xff] %v1253_v57  ;;  %1259 = vst [vmem:[#allocation2 + $0x160] sm:$0xff] %v1252_v58  ;;  %v1249_v61 = vmul.f32 %v3752_v19, %v1243_v59  ;;  %v1248_v62 = vmul.f32 %v3752_v19, %v1236_v60 }
 0x13c   : > { %v1255_v63 = vadd.f32 %v3757_v34, %v1249_v61  ;;  %v1254_v0 = vadd.f32 %v3757_v34, %v1248_v62 }
 0x13e   : > { %1262 = vst [vmem:[#allocation2 + $0x178] sm:$0xff] %v1255_v63  ;;  %1261 = vst [vmem:[#allocation2 + $0x170] sm:$0xff] %v1254_v0 }
 0x13f LB: >> { %v3868_v19 = vpack.c.bf16 %v3719_v6, %v3714_v16  ;;  %v3301_v34 = vmov 0.0|0.0   ;;  %s3302_s27 = smov 32   ;;  %v3876_v3 = vpack.c.bf16 %v3735_v18, %v3724_v17  ;;  %vm3303_vm0 = vmmov 0   ;;  %s2787_s23 = sshll.u32 %s3295_s25, 6  ;;  %s3295_s25 = sphi %s3859_s25, %s1272_s25   ;;  %v3291_v2 = vphi %v3857_v2, %v4101_v2   ;;  %v3287_v1 = vphi %v3855_v1, %v2093_v1  }
 0x140   : >> { %2973 = vmatprep.subr.bf16.mxu0 %v3301_v34  ;;  %2979 = vmatprep.subr.bf16.mxu1 %v3301_v34  ;;  %v3304_v4 = vmov 0.0   ;;  %vm1282_vm1 = vcmask 261120   ;;  %s3897_s22 = scalar_lea.vmem [#allocation2], %s2787_s23  ;;  %s3305_s28 = smov 64  }
 0x141   : >> { %1280 = vrot.lane.b32.xlu0 %v3291_v2, %s3302_s27  ;;  %2975 = vmatpush3.bf16.msra.mxu0 %v3868_v19  ;;  %s1272_s25 = sadd.s32 1, %s3295_s25  }
 0x142   : >> { %2976 = vmatprep.subr.bf16.mxu0 %v3301_v34  ;;  %2858 = vmatprep.mubr.msk.f32.mxu0 %vm3303_vm0, %v3304_v4  ;;  %p1269_p13 = scmp.ge.s32.totalorder %s1272_s25, 6  }
 0x143   : >> { %2981 = vmatpush3.bf16.msra.mxu1 %v3868_v19  ;;  %2869 = vmatprep.mubr.msk.f32.mxu1 %vm3303_vm0, %v3304_v4  ;;  %s3306_s30 = smov (%p1269_p13), 32   ;;  %v2103_v16 = vld [vmem:[%s4064_s7 + $0x18] sm:$0xff] (%p1269_p13)  ;;  %v2187_v6 = vld [vmem:[%s4066_s9] sm:$0xff] (%p1269_p13)  ;;  %v2188_v17 = vld [vmem:[%s4066_s9 + $0x8] sm:$0x3] (%p1269_p13)  ;;  %vm2200_vm2 = vcmask (%p1269_p13), 1041408  }
 0x144   : >> { %2982 = vmatprep.subr.bf16.mxu1 %v3301_v34  ;;  %vm3308_vm3 = vmmov (%p1269_p13), 0   ;;  %v3309_v18 = vmov (%p1269_p13), 0.0   ;;  %vm3310_vm4 = vmmov (%p1269_p13), 1   ;;  %vm2196_vm6 = vcmask (%p1269_p13), 80896  }
 0x145   : >> { %2978 = vmatpush3.bf16.msra.mxu0 %v3876_v3  ;;  %v1278_v7 = vld [vmem:[%s3897_s22] sm:$0xff]  ;;  %v2736_v43 = vld [vmem:[%s3897_s22 + $0x8] sm:$0xff]  ;;  %v2741_v50 = vld [vmem:[%s3897_s22 + $0x10] sm:$0xff]  ;;  %vm2287_vm7 = vcmask (%p1269_p13), 1044480   ;;  %vm2283_vm8 = vcmask (%p1269_p13), 39936   ;;  %vm2484_vm9 = vcmask (%p1269_p13), 15360  }
 0x146   : >> { %2985 = vmatprep.subr.bf16.mxu0 %v3301_v34  ;;  %vm4000_vm5 = vmpackc.low (%p1269_p13), %vm2200_vm2, %vm3310_vm4  ;;  %vm2561_vm10 = vcmask (%p1269_p13), 7168  }
 0x147   : >> { %2984 = vmatpush3.bf16.msra.mxu1 %v3876_v3 }
 0x148   : >> { %2991 = vmatprep.subr.bf16.mxu1 %v3301_v34 }
 0x1b3   : >> { %v1281_v5 = vpop.permute.xlu0 %1280 }
 0x1b4   : >> { %2859 = vmatmul.mubr.msk.f32.vlgmr.msra.gmra.mrb[0].mxu0 %vm1282_vm1, %v1281_v5 }
 0x1b5   : >> { %2987 = vmatpush3.bf16.msra.mxu0 %v3868_v19  ;;  %2880 = vmatprep.mubr.msk.f32.mxu0 %vm3303_vm0, %v3304_v4 }
 0x1b6   : >> { %2988 = vmatprep.subr.bf16.mxu0 %v3301_v34 }
 0x1b9   : >> { %2990 = vmatpush3.bf16.msra.mxu0 %v3876_v3 }
 0x1ba   : >> { %2997 = vmatprep.subr.bf16.mxu0 %v3301_v34 }
 0x287   : >> { %v1351_v9 = vpop.f32.mrb[0].mxu0 }
 0x288   : >> { %v1352_v8 = vadd.f32 %v1351_v9, %v1278_v7  ;;  %v2860_v10 = vpop.f32.mrb[1].mxu0  ;;  %v2746_v7 = vld [vmem:[%s3897_s22 + $0x18] sm:$0xff] }
 0x28a   : >> { %3122 = vtanh.f32 %v1352_v8  ;;  %v2733_v13 = vmul.f32 -1.442695, %v1352_v8 }
 0x28c   : >> { %3124 = vpow2.f32 %v2733_v13 }
 0x294   : >> { %v3123_v11 = vpop.eup %3122 }
 0x295   : >> { %1364 = vrot.lane.b32.xlu0 %v3123_v11, %s3305_s28 }
 0x296   : >> { %v3125_v14 = vpop.eup %3124 }
 0x297   : >> { %v1358_v15 = vadd.f32 1.0, %v3125_v14 }
 0x299   : >> { %3126 = vrcp.f32 %v1358_v15 }
 0x2a3   : >> { %v3127_v12 = vpop.eup %3126 }
 0x2a4   : >> { %v1362_v26 = vmul.f32 %v3287_v1, %v3127_v12 }
 0x307   : >> { %v1365_v23 = vpop.permute.xlu0 %1364 }
 0x308   : >> { %v1367_v24 = vmul.f32 %v3127_v12, %v1365_v23 }
 0x30a   : >> { %1369 = vrot.lane.b32.xlu1 %v1367_v24, %s3302_s27 }
 0x37c   : >> { %v1370_v29 = vpop.permute.xlu1 %1369 }
 0x37d   : >> { %v1372_v30 = vadd.f32 %v1370_v29, %v1362_v26 }
 0x37f   : >> { %3128 = vtanh.f32 %v1372_v30 }
 0x389   : >> { %v3129_v31 = vpop.eup %3128 }
 0x38a   : >> { %1375 = vrot.lane.b32.xlu1 %v3129_v31, %s3305_s28 }
 0x3fc   : >> { %v1376_v40 = vpop.permute.xlu1 %1375 }
 0x3fd   : >> { %v1378_v20 = vmul.f32 %v3127_v12, %v1376_v40 }
 0x3ff   : >> { %1384 = vrot.lane.b32.xlu0 %v1378_v20, %s3302_s27 }
 0x471   : >> { %v1385_v42 = vpop.permute.xlu0 %1384 }
 0x472   : >> { %2870 = vmatmul.mubr.msk.f32.vlgmr.msra.gmra.mrb[0].mxu1 %vm1282_vm1, %v1385_v42 }
 0x473   : >> { %2993 = vmatpush3.bf16.msra.mxu1 %v3868_v19  ;;  %2891 = vmatprep.mubr.msk.f32.mxu1 %vm3303_vm0, %v3304_v4 }
 0x474   : >> { %2994 = vmatprep.subr.bf16.mxu1 %v3301_v34 }
 0x477   : >> { %2996 = vmatpush3.bf16.msra.mxu1 %v3876_v3 }
 0x478   : >> { %3003 = vmatprep.subr.bf16.mxu1 %v3301_v34 }
 0x545   : >> { %v1454_v21 = vpop.f32.mrb[0].mxu1 }
 0x546   : >> { %v1455_v27 = vadd.f32 %v2736_v43, %v1454_v21  ;;  %v2871_v22 = vpop.f32.mrb[1].mxu1  ;;  %v2751_v43 = vld [vmem:[%s3897_s22 + $0x20] sm:$0xff] }
 0x548   : >> { %3130 = vtanh.f32 %v1455_v27  ;;  %v2738_v32 = vmul.f32 -1.442695, %v1455_v27 }
 0x54a   : >> { %3132 = vpow2.f32 %v2738_v32 }
 0x552   : >> { %v3131_v41 = vpop.eup %3130 }
 0x553   : >> { %1467 = vrot.lane.b32.xlu1 %v3131_v41, %s3305_s28 }
 0x554   : >> { %v3133_v47 = vpop.eup %3132 }
 0x555   : >> { %v1461_v25 = vadd.f32 1.0, %v3133_v47 }
 0x557   : >> { %3134 = vrcp.f32 %v1461_v25 }
 0x561   : >> { %v3135_v33 = vpop.eup %3134 }
 0x562   : >> { %v1465_v38 = vmul.f32 %v3135_v33, %v1372_v30 }
 0x5c5   : >> { %v1468_v36 = vpop.permute.xlu1 %1467 }
 0x5c6   : >> { %v1470_v37 = vmul.f32 %v3135_v33, %v1468_v36 }
 0x5c8   : >> { %1472 = vrot.lane.b32.xlu0 %v1470_v37, %s3302_s27 }
 0x63a   : >> { %v1473_v39 = vpop.permute.xlu0 %1472 }
 0x63b   : >> { %v1475_v44 = vadd.f32 %v1473_v39, %v1465_v38 }
 0x63d   : >> { %3136 = vtanh.f32 %v1475_v44 }
 0x647   : >> { %v3137_v45 = vpop.eup %3136 }
 0x648   : >> { %1478 = vrot.lane.b32.xlu1 %v3137_v45, %s3305_s28 }
 0x6ba   : >> { %v1479_v46 = vpop.permute.xlu1 %1478 }
 0x6bb   : >> { %v1481_v48 = vmul.f32 %v3135_v33, %v1479_v46 }
 0x6bd   : >> { %1487 = vrot.lane.b32.xlu0 %v1481_v48, %s3302_s27 }
 0x72f   : >> { %v1488_v49 = vpop.permute.xlu0 %1487 }
 0x730   : >> { %2881 = vmatmul.mubr.msk.f32.vlgmr.msra.gmra.mrb[2].mxu0 %vm1282_vm1, %v1488_v49 }
 0x731   : >> { %2999 = vmatpush3.bf16.msra.mxu0 %v3868_v19  ;;  %2902 = vmatprep.mubr.msk.f32.mxu0 %vm3303_vm0, %v3304_v4 }
 0x732   : >> { %3000 = vmatprep.subr.bf16.mxu0 %v3301_v34 }
 0x735   : >> { %3002 = vmatpush3.bf16.msra.mxu0 %v3876_v3 }
 0x736   : >> { %3009 = vmatprep.subr.bf16.mxu0 %v3301_v34 }
 0x803   : >> { %v1557_v51 = vpop.f32.mrb[2].mxu0 }
 0x804   : >> { %v1558_v52 = vadd.f32 %v2741_v50, %v1557_v51  ;;  %v2882_v53 = vpop.f32.mrb[3].mxu0  ;;  %v2756_v50 = vld [vmem:[%s3897_s22 + $0x28] sm:$0xff] }
 0x806   : >> { %3138 = vtanh.f32 %v1558_v52  ;;  %v2743_v55 = vmul.f32 -1.442695, %v1558_v52 }
 0x808   : >> { %3140 = vpow2.f32 %v2743_v55 }
 0x810   : >> { %v3139_v54 = vpop.eup %3138 }
 0x811   : >> { %1570 = vrot.lane.b32.xlu1 %v3139_v54, %s3305_s28 }
 0x812   : >> { %v3141_v56 = vpop.eup %3140 }
 0x813   : >> { %v1564_v57 = vadd.f32 1.0, %v3141_v56 }
 0x815   : >> { %3142 = vrcp.f32 %v1564_v57 }
 0x81f   : >> { %v3143_v58 = vpop.eup %3142 }
 0x820   : >> { %v1568_v61 = vmul.f32 %v3143_v58, %v1475_v44 }
 0x883   : >> { %v1571_v59 = vpop.permute.xlu1 %1570 }
 0x884   : >> { %v1573_v60 = vmul.f32 %v3143_v58, %v1571_v59 }
 0x886   : >> { %1575 = vrot.lane.b32.xlu0 %v1573_v60, %s3302_s27 }
 0x8f8   : >> { %v1576_v62 = vpop.permute.xlu0 %1575 }
 0x8f9   : >> { %v1578_v63 = vadd.f32 %v1576_v62, %v1568_v61 }
 0x8fb   : >> { %3144 = vtanh.f32 %v1578_v63 }
 0x905   : >> { %v3145_v0 = vpop.eup %3144 }
 0x906   : >> { %1581 = vrot.lane.b32.xlu1 %v3145_v0, %s3305_s28  ;;  %v2761_v0 = vld [vmem:[%s3897_s22 + $0x30] sm:$0xff] }
 0x978   : >> { %v1582_v1 = vpop.permute.xlu1 %1581 }
 0x979   : >> { %v1584_v2 = vmul.f32 %v3143_v58, %v1582_v1 }
 0x97b   : >> { %1590 = vrot.lane.b32.xlu0 %v1584_v2, %s3302_s27 }
 0x9ed   : >> { %v1591_v5 = vpop.permute.xlu0 %1590 }
 0x9ee   : >> { %2892 = vmatmul.mubr.msk.f32.vlgmr.msra.gmra.mrb[2].mxu1 %vm1282_vm1, %v1591_v5 }
 0x9ef   : >> { %3005 = vmatpush3.bf16.msra.mxu1 %v3868_v19  ;;  %2913 = vmatprep.mubr.msk.f32.mxu1 %vm3303_vm0, %v3304_v4 }
 0x9f0   : >> { %3006 = vmatprep.subr.bf16.mxu1 %v3301_v34 }
 0x9f3   : >> { %3008 = vmatpush3.bf16.msra.mxu1 %v3876_v3 }
 0x9f4   : >> { %3015 = vmatprep.subr.bf16.mxu1 %v3301_v34 }
 0xac1   : >> { %v1660_v9 = vpop.f32.mrb[2].mxu1 }
 0xac2   : >> { %v1661_v8 = vadd.f32 %v2746_v7, %v1660_v9  ;;  %v2893_v10 = vpop.f32.mrb[3].mxu1 }
 0xac4   : >> { %3146 = vtanh.f32 %v1661_v8  ;;  %v2748_v13 = vmul.f32 -1.442695, %v1661_v8 }
 0xac6   : >> { %3148 = vpow2.f32 %v2748_v13 }
 0xace   : >> { %v3147_v11 = vpop.eup %3146 }
 0xacf   : >> { %1673 = vrot.lane.b32.xlu1 %v3147_v11, %s3305_s28 }
 0xad0   : >> { %v3149_v14 = vpop.eup %3148 }
 0xad1   : >> { %v1667_v15 = vadd.f32 1.0, %v3149_v14 }
 0xad3   : >> { %3150 = vrcp.f32 %v1667_v15 }
 0xadd   : >> { %v3151_v12 = vpop.eup %3150 }
 0xade   : >> { %v1671_v26 = vmul.f32 %v3151_v12, %v1578_v63 }
 0xb41   : >> { %v1674_v23 = vpop.permute.xlu1 %1673 }
 0xb42   : >> { %v1676_v24 = vmul.f32 %v3151_v12, %v1674_v23 }
 0xb44   : >> { %1678 = vrot.lane.b32.xlu0 %v1676_v24, %s3302_s27 }
 0xbb6   : >> { %v1679_v29 = vpop.permute.xlu0 %1678 }
 0xbb7   : >> { %v1681_v30 = vadd.f32 %v1679_v29, %v1671_v26 }
 0xbb9   : >> { %3152 = vtanh.f32 %v1681_v30 }
 0xbc3   : >> { %v3153_v31 = vpop.eup %3152 }
 0xbc4   : >> { %1684 = vrot.lane.b32.xlu1 %v3153_v31, %s3305_s28  ;;  %v2766_v31 = vld [vmem:[%s3897_s22 + $0x38] sm:$0xff]  ;;  %s4104_s22 = sld [smem:[#allocation20_spill]] (%p1269_p13) }
 0xc36   : >> { %v1685_v40 = vpop.permute.xlu1 %1684 }
 0xc37   : >> { %v1687_v20 = vmul.f32 %v3151_v12, %v1685_v40 }
 0xc39   : >> { %1693 = vrot.lane.b32.xlu0 %v1687_v20, %s3302_s27 }
 0xcab   : >> { %v1694_v42 = vpop.permute.xlu0 %1693 }
 0xcac   : >> { %2903 = vmatmul.mubr.msk.f32.vlgmr.msra.gmra.mrb[4].mxu0 %vm1282_vm1, %v1694_v42 }
 0xcad   : >> { %3011 = vmatpush3.bf16.msra.mxu0 %v3868_v19  ;;  %2924 = vmatprep.mubr.msk.f32.mxu0 %vm3303_vm0, %v3304_v4 }
 0xcae   : >> { %3012 = vmatprep.subr.bf16.mxu0 %v3301_v34 }
 0xcb1   : >> { %3014 = vmatpush3.bf16.msra.mxu0 %v3876_v3 }
 0xd7f   : >> { %v1763_v21 = vpop.f32.mrb[4].mxu0 }
 0xd80   : >> { %v1764_v27 = vadd.f32 %v2751_v43, %v1763_v21  ;;  %v2904_v22 = vpop.f32.mrb[5].mxu0 }
 0xd82   : >> { %3154 = vtanh.f32 %v1764_v27  ;;  %v2753_v32 = vmul.f32 -1.442695, %v1764_v27 }
 0xd84   : >> { %3156 = vpow2.f32 %v2753_v32 }
 0xd8c   : >> { %v3155_v41 = vpop.eup %3154 }
 0xd8d   : >> { %1776 = vrot.lane.b32.xlu1 %v3155_v41, %s3305_s28 }
 0xd8e   : >> { %v3157_v47 = vpop.eup %3156 }
 0xd8f   : >> { %v1770_v25 = vadd.f32 1.0, %v3157_v47 }
 0xd91   : >> { %3158 = vrcp.f32 %v1770_v25 }
 0xd9b   : >> { %v3159_v33 = vpop.eup %3158 }
 0xd9c   : >> { %v1774_v38 = vmul.f32 %v3159_v33, %v1681_v30 }
 0xdff   : >> { %v1777_v36 = vpop.permute.xlu1 %1776 }
 0xe00   : >> { %v1779_v37 = vmul.f32 %v3159_v33, %v1777_v36 }
 0xe02   : >> { %1781 = vrot.lane.b32.xlu0 %v1779_v37, %s3302_s27 }
 0xe74   : >> { %v1782_v39 = vpop.permute.xlu0 %1781 }
 0xe75   : >> { %v1784_v44 = vadd.f32 %v1782_v39, %v1774_v38  ;;  %v2100_v39 = vld [vmem:[%s4064_s7] sm:$0xff] (%p1269_p13) }
 0xe77   : >> { %3160 = vtanh.f32 %v1784_v44 }
 0xe81   : >> { %v3161_v45 = vpop.eup %3160 }
 0xe82   : >> { %1787 = vrot.lane.b32.xlu1 %v3161_v45, %s3305_s28  ;;  %v2102_v45 = vld [vmem:[%s4064_s7 + $0x10] sm:$0xff] (%p1269_p13) }
 0xef4   : >> { %v1788_v46 = vpop.permute.xlu1 %1787 }
 0xef5   : >> { %v1790_v48 = vmul.f32 %v3159_v33, %v1788_v46  ;;  %v3307_v46 = vmov (%p1269_p13), 0.0|0.0  }
 0xef6   : > { %3021 = vmatprep.subr.bf16.mxu0 (%p1269_p13), %v3307_v46 }
 0xef7   : >> { %1796 = vrot.lane.b32.xlu0 %v1790_v48, %s3302_s27 }
 0xf69   : >> { %v1797_v49 = vpop.permute.xlu0 %1796 }
 0xf6a   : >> { %2914 = vmatmul.mubr.msk.f32.vlgmr.msra.gmra.mrb[4].mxu1 %vm1282_vm1, %v1797_v49  ;;  %v3028_v49 = vpack.c.bf16 (%p1269_p13), %v2188_v17, %v2187_v6 }
 0xf6b   : >> { %3017 = vmatpush3.bf16.msra.mxu1 %v3868_v19  ;;  %2935 = vmatprep.mubr.msk.f32.mxu1 %vm3303_vm0, %v3304_v4 }
 0xf6c   : >> { %3018 = vmatprep.subr.bf16.mxu1 %v3301_v34 }
 0xf6f   : >> { %3020 = vmatpush3.bf16.msra.mxu1 %v3876_v3 }
 0xf70   : > { %3027 = vmatprep.subr.bf16.mxu1 (%p1269_p13), %v3307_v46 }
0x103d   : >> { %v1866_v51 = vpop.f32.mrb[4].mxu1 }
0x103e   : >> { %v1867_v52 = vadd.f32 %v2756_v50, %v1866_v51  ;;  %v2915_v53 = vpop.f32.mrb[5].mxu1  ;;  %v3025_v50 = vpack.c.bf16 (%p1269_p13), %v2103_v16, %v2102_v45 }
0x103f   : > { %v2769_v53 = vld [vmem:[%s4065_s8] ss:$0 sm:$0xff] (%p1269_p13) }
0x1040   : >> { %3162 = vtanh.f32 %v1867_v52  ;;  %v2758_v55 = vmul.f32 -1.442695, %v1867_v52 }
0x1042   : >> { %3164 = vpow2.f32 %v2758_v55 }
0x104a   : >> { %v3163_v54 = vpop.eup %3162 }
0x104b   : >> { %1879 = vrot.lane.b32.xlu1 %v3163_v54, %s3305_s28 }
0x104c   : >> { %v3165_v56 = vpop.eup %3164 }
0x104d   : >> { %v1873_v57 = vadd.f32 1.0, %v3165_v56 }
0x104f   : >> { %3166 = vrcp.f32 %v1873_v57  ;;  %v2275_v57 = vld [vmem:[%s4068_s11] sm:$0x1f] (%p1269_p13) }
0x1059   : >> { %v3167_v19 = vpop.eup %3166 }
0x105a   : >> { %v1877_v34 = vmul.f32 %v3167_v19, %v1784_v44  ;;  %v2101_v44 = vld [vmem:[%s4064_s7 + $0x8] sm:$0xff] (%p1269_p13) }
0x105b   : > { %v3022_v48 = vpack.c.bf16 (%p1269_p13), %v2101_v44, %v2100_v39 }
0x10bd   : >> { %v1880_v4 = vpop.permute.xlu1 %1879 }
0x10be   : >> { %v1882_v58 = vmul.f32 %v3167_v19, %v1880_v4  ;;  %v2361_v4 = vld [vmem:[%s4070_s13] sm:$0xff] (%p1269_p13) }
0x10c0   : >> { %1884 = vrot.lane.b32.xlu0 %v1882_v58, %s3302_s27  ;;  %v2362_v58 = vld [vmem:[%s4070_s13 + $0x8] sm:$0x3] (%p1269_p13) }
0x1132   : >> { %v1885_v3 = vpop.permute.xlu0 %1884 }
0x1133   : >> { %v1887_v59 = vadd.f32 %v1885_v3, %v1877_v34  ;;  %v3311_v34 = vmov (%p1269_p13), 0   ;;  %v3032_v3 = vpack.c.bf16 (%p1269_p13), %v2362_v58, %v2361_v4 }
0x1134   : > { %3186 = vset.pattern.permute.xlu0 (%p1269_p13), %v3311_v34  ;;  %3187 = vset.pattern.permute.xlu1 (%p1269_p13), %v3311_v34 }
0x1135   : >> { %3168 = vtanh.f32 %v1887_v59 }
0x113f   : >> { %v3169_v60 = vpop.eup %3168 }
0x1140   : >> { %1890 = vrot.lane.b32.xlu1 %v3169_v60, %s3305_s28 }
0x11b2   : >> { %v1891_v61 = vpop.permute.xlu1 %1890 }
0x11b3   : >> { %v1893_v62 = vmul.f32 %v3167_v19, %v1891_v61  ;;  %v2274_v19 = vld [vmem:[%s3704_s1] sm:$0xff] (%p1269_p13) }
0x11b5   : >> { %1899 = vrot.lane.b32.xlu0 %v1893_v62, %s3302_s27 }
0x1227   : >> { %v1900_v63 = vpop.permute.xlu0 %1899 }
0x1228   : >> { %2925 = vmatmul.mubr.msk.f32.vlgmr.msra.gmra.mrb[6].mxu0 %vm1282_vm1, %v1900_v63  ;;  %v2774_v63 = vld [vmem:[%s4069_s12] ss:$0 sm:$0xff] (%p1269_p13) }
0x1229   : > { %2946 = vmatprep.mubr.msk.f32.mxu0 (%p1269_p13), %vm3308_vm3, %v3309_v18  ;;  %3023 = vmatpush3.bf16.msra.mxu0 (%p1269_p13), %v3022_v48 }
0x122a   : > { %3024 = vmatprep.subr.bf16.mxu0 (%p1269_p13), %v3307_v46 }
0x122d   : > { %3026 = vmatpush3.bf16.msra.mxu0 (%p1269_p13), %v3025_v50 }
0x122e   : > { %3031 = vmatprep.subr.bf16.mxu0 (%p1269_p13), %v3307_v46 }
0x12fb   : >> { %v1969_v1 = vpop.f32.mrb[6].mxu0 }
0x12fc   : >> { %v1970_v2 = vadd.f32 %v2761_v0, %v1969_v1  ;;  %v2926_v5 = vpop.f32.mrb[7].mxu0 }
0x12fd   : > { %v2777_v5 = vld [vmem:[#allocation5] ss:$0 sm:$0xff] (%p1269_p13) }
0x12fe   : >> { %3170 = vtanh.f32 %v1970_v2  ;;  %v2763_v9 = vmul.f32 -1.442695, %v1970_v2 }
0x1300   : >> { %3172 = vpow2.f32 %v2763_v9 }
0x1308   : >> { %v3171_v7 = vpop.eup %3170 }
0x1309   : >> { %1982 = vrot.lane.b32.xlu1 %v3171_v7, %s3305_s28 }
0x130a   : >> { %v3173_v8 = vpop.eup %3172 }
0x130b   : >> { %v1976_v10 = vadd.f32 1.0, %v3173_v8 }
0x130d   : >> { %3174 = vrcp.f32 %v1976_v10  ;;  %v2476_v10 = vld [vmem:[%s4073_s17] sm:$0x3] (%p1269_p13) }
0x1317   : >> { %v3175_v11 = vpop.eup %3174 }
0x1318   : >> { %v1980_v15 = vmul.f32 %v3175_v11, %v1887_v59  ;;  %v2771_v59 = vld [vmem:[#allocation4] ss:$0 sm:$0xff] (%p1269_p13) }
0x137b   : >> { %v1983_v13 = vpop.permute.xlu1 %1982 }
0x137c   : >> { %v1985_v14 = vmul.f32 %v3175_v11, %v1983_v13 }
0x137e   : >> { %1987 = vrot.lane.b32.xlu0 %v1985_v14, %s3302_s27 }
0x13f0   : >> { %v1988_v12 = vpop.permute.xlu0 %1987 }
0x13f1   : >> { %v1990_v23 = vadd.f32 %v1988_v12, %v1980_v15 }
0x13f3   : >> { %3176 = vtanh.f32 %v1990_v23 }
0x13fd   : >> { %v3177_v24 = vpop.eup %3176 }
0x13fe   : >> { %1993 = vrot.lane.b32.xlu1 %v3177_v24, %s3305_s28 }
0x1470   : >> { %v1994_v26 = vpop.permute.xlu1 %1993 }
0x1471   : >> { %v1996_v29 = vmul.f32 %v3175_v11, %v1994_v26  ;;  %v2446_v11 = vld [vmem:[%s4071_s15] sm:$0x3] (%p1269_p13) }
0x1472   : > { %v2455_v13 = vrot.slane (%p1269_p13), %v2446_v11, %v3566_v28  ;;  %v2465_v14 = vrot.slane (%p1269_p13), %v2446_v11, %v3573_v35  ;;  %v2780_v26 = vld [vmem:[%s4104_s22] ss:$0 sm:$0xff] (%p1269_p13) }
0x1473   : >> { %2002 = vrot.lane.b32.xlu0 %v1996_v29, %s3302_s27 }
0x14e5   : >> { %v2003_v30 = vpop.permute.xlu0 %2002 }
0x14e6   : >> { %2936 = vmatmul.mubr.msk.f32.vlgmr.msra.gmra.mrb[6].mxu1 %vm1282_vm1, %v2003_v30 }
0x14e7   : > { %2953 = vmatprep.mubr.msk.f32.mxu1 (%p1269_p13), %vm3308_vm3, %v3309_v18  ;;  %3030 = vmatpush3.bf16.msk.msra.mxu1 (%p1269_p13), %vm4000_vm5, %v3028_v49 }
0x14e8   : > { %2956 = vmatprep.subr.mxu1 (%p1269_p13), %v3309_v18 }
0x15b9   : >> { %v2072_v40 = vpop.f32.mrb[6].mxu1 }
0x15ba   : >> { %v2073_v20 = vadd.f32 %v2766_v31, %v2072_v40  ;;  %v2937_v42 = vpop.f32.mrb[7].mxu1  ;;  %v2781_v31 = vld [vmem:[#allocation6] ss:$0 sm:$0xff] (%p1269_p13) }
0x15bc   : >> { %3178 = vtanh.f32 %v2073_v20  ;;  %v2768_v21 = vmul.f32 -1.442695, %v2073_v20 }
0x15be   : >> { %3180 = vpow2.f32 %v2768_v21 }
0x15c6   : >> { %v3179_v43 = vpop.eup %3178 }
0x15c7   : >> { %2085 = vrot.lane.b32.xlu1 %v3179_v43, %s3305_s28 }
0x15c8   : >> { %v3181_v27 = vpop.eup %3180 }
0x15c9   : >> { %v2079_v22 = vadd.f32 1.0, %v3181_v27 }
0x15cb   : >> { %3182 = vrcp.f32 %v2079_v22 }
0x15d5   : >> { %v3183_v41 = vpop.eup %3182 }
0x15d6   : >> { %v2083_v25 = vmul.f32 %v3183_v41, %v1990_v23 }
0x1639   : >> { %v2086_v32 = vpop.permute.xlu1 %2085 }
0x163a   : >> { %v2088_v47 = vmul.f32 %v3183_v41, %v2086_v32 }
0x163c   : >> { %2090 = vrot.lane.b32.xlu0 %v2088_v47, %s3302_s27 }
0x16ae   : >> { %v2091_v33 = vpop.permute.xlu0 %2090 }
0x16af   : >> { %v2093_v1 = vadd.f32 %v2091_v33, %v2083_v25  }
0x16b1   : >> { %3184 = vtanh.f32 %v2093_v1 }
0x16bb   : >> { %v3185_v36 = vpop.eup %3184 }
0x16bc   : >> { %2096 = vrot.lane.b32.xlu1 %v3185_v36, %s3305_s28 }
0x172b   : > { %1271 = sbr.rel (!%p1269_p13) target bundleno = 319 (0x13f), region = 173 }
0x172e   : >> { %v2097_v37 = vpop.permute.xlu1 %2096 }
0x172f   : >> { %v2099_v38 = vmul.f32 %v3183_v41, %v2097_v37  }
0x1731   : >> { %v4101_v2 = vmov %v2099_v38  ;;  %2112 = vrot.lane.b32.xlu0 (%p1269_p13), %v2099_v38, %s3306_s30 }
0x17a3   : > { %v2113_v52 = vpop.permute.xlu0 %2112 }
0x17a4   : > { %2947 = vmatmul.mubr.msk.f32.vlgmr.msra.gmra.mrb[0].mxu0 %vm1282_vm1, %v2113_v52 }
0x17a5   : > { %2965 = vmatprep.mubr.msk.f32.mxu0 %vm3308_vm3, %v3309_v18  ;;  %3034 = vmatpush3.bf16.msk.msra.mxu0 %vm4000_vm5, %v3032_v3 }
0x1877   : > { %v2183_v54 = vpop.f32.mrb[0].mxu0 }
0x1878   : > { %v2184_v55 = vadd.f32 %v2769_v53, %v2183_v54  ;;  %v2948_v56 = vpop.f32.mrb[1].mxu0 }
0x187a   : > { %2954 = vmatmul.mubr.msk.f32.vlgmr.msra.gmra.mrb[0].mxu1 %vm2196_vm6, %v2184_v55 }
0x187b   : > { %2957 = vmatpush3.msk.msra.mxu1 %vm2287_vm7, %v2275_v57  ;;  %2958 = vmatprep.mubr.msk.f32.mxu1 %vm3308_vm3, %v3309_v18 }
0x187c   : > { %2968 = vmatprep.subr.mxu1 %v3309_v18 }
0x187e   : > { %2959 = vmatmul.mubr.msk.f32.vlgmr.msra.gmra.mrb[2].mxu1 %vm2283_vm8, %v2274_v19 }
0x187f   : > { %2970 = vmatprep.mubr.msk.f32.mxu1 %vm3308_vm3, %v3309_v18  ;;  %2969 = vmatpush3.msk.msra.mxu1 %vm2200_vm2, %v2476_v10 }
0x194d   : > { %v2270_v60 = vpop.f32.mrb[0].mxu1 }
0x194e   : > { %v2271_v61 = vadd.f32 %v2771_v59, %v2270_v60  ;;  %v2955_v62 = vpop.f32.mrb[1].mxu1 }
0x1950   : > { %2449 = vperm.xlu0 %3186, %v2271_v61  }
0x1951   : > { %v2357_v0 = vpop.f32.mrb[2].mxu1 }
0x1952   : > { %v2358_v1 = vadd.f32 %v2774_v63, %v2357_v0  ;;  %v2960_v2 = vpop.f32.mrb[3].mxu1 }
0x1954   : > { %2966 = vmatmul.mubr.msk.f32.vlgmr.msra.gmra.mrb[2].mxu0 %vm2196_vm6, %v2358_v1 }
0x19cf   : > { %v2450_v15 = vpop.permute.xlu0 %2449 }
0x19d0   : > { %v2456_v23 = vmul.f32 %v2455_v13, %v2450_v15 }
0x1a27   : > { %v2442_v7 = vpop.f32.mrb[2].mxu0 }
0x1a28   : > { %v2443_v9 = vadd.f32 %v2777_v5, %v2442_v7  ;;  %v2967_v8 = vpop.f32.mrb[3].mxu0 }
0x1a2a   : > { %2459 = vperm.xlu1 %3187, %v2443_v9  }
0x1aa9   : > { %v2460_v12 = vpop.permute.xlu1 %2459 }
0x1aaa   : > { %v2466_v24 = vmul.f32 %v2465_v14, %v2460_v12 }
0x1aac   : > { %v2467_v29 = vadd.f32 %v2466_v24, %v2456_v23 }
0x1aae   : > { %v2475_v30 = vadd.f32 %v2780_v26, %v2467_v29 }
0x1ab0   : > { %2971 = vmatmul.mubr.msk.f32.vlgmr.msra.gmra.mrb[4].mxu1 %vm2484_vm9, %v2475_v30 }
0x1b83   : > { %v2557_v40 = vpop.f32.mrb[4].mxu1 }
0x1b84   : > { %v2558_v20 = vadd.f32 %v2781_v31, %v2557_v40  ;;  %v2972_v28 = vpop.f32.mrb[5].mxu1 }
0x1b86   : > { %2562 = vst.msk [vmem:[%s3709_s10] sm:$0xff] %vm2561_vm10, %v2558_v20 }
0x1b87 PF: > { %s4105_s10 = sld [smem:[#allocation14_spill]]  ;;  %s4106_s28 = sld [smem:[#allocation13_spill]] }
0x1b88   : > { %s4107_s26 = sld [smem:[#allocation15_spill]]  ;;  %s4108_s25 = smov %s3275_s3 }
0x1b8d   : > { %p37_p1 = scmp.ge.s32.totalorder %s4105_s10, 4   ;;  %s4109_s3 = smov %s4106_s28 }
0x1b8f   :  { %39 = sbr.rel (!%p37_p1) target bundleno = 16 (0x10), region = 184 }
0x1b96   :  { %2582 = vsyncpa [#allocation8], 1 }
0x1b97   :  { %2584 = vsyncpa [#allocation8 + $0x1], 1 }
0x1b98   :  { %2585 = vsyncpa [#allocation9], 1 }
0x1b99   :  { %2587 = vsyncpa [#allocation9 + $0x1], 1 }

</bundles_post_ra>
